<compile_context>
chip_gen: v6e
topology: v6e:2x2x1
jax: 0.10.0
libtpu: 0.0.40
codegen_flags: <defaults>
</compile_context>

<pallas_src>
import functools

import jax
import jax.numpy as jnp
from jax import lax
from jax.experimental import pallas as pl
from jax.experimental.pallas import tpu as pltpu


def _rnn_chunk_kernel(x_ref, w_ih_ref, w_hh_ref, b_ref, o_ref, h_ref,
                      *, ts, b_sz, mxu_dtype):
    """Processes `ts` consecutive timesteps of the tanh-RNN recurrence.

    x_ref   : (ts*B, D)     flattened input chunk (native dtype)
    w_ih_ref: (D, H)        input->hidden weight (pre-transposed)
    w_hh_ref: (H, H)        hidden->hidden weight (pre-transposed)
    b_ref   : (1, H)  f32   combined bias (b_ih + b_hh)
    o_ref   : (ts*B, H)     output chunk
    h_ref   : (B, H)  f32   hidden state carried across grid steps (scratch)
    """
    # self.hidden is a zeros Variable at construction time.
    @pl.when(pl.program_id(0) == 0)
    def _():
        h_ref[...] = jnp.zeros_like(h_ref)

    # One big MXU matmul for the whole chunk's input projection; bias folded
    # in once per chunk.  Result lives in vregs (ts*B*H f32 = a few vregs per
    # timestep), so there is no xw VMEM round trip on the serial chain.
    lhs = x_ref[...]
    rhs = w_ih_ref[...]
    if mxu_dtype is not None:
        lhs = lhs.astype(mxu_dtype)
        rhs = rhs.astype(mxu_dtype)
    xw = jnp.dot(lhs, rhs, preferred_element_type=jnp.float32) + b_ref[...]

    w_hh = w_hh_ref[...].astype(jnp.float32)

    # Hidden state carried in registers inside the chunk (one (8,128) vreg at
    # B=8, H=128); written back to h_ref once, after the loop.
    h = h_ref[...]
    for t in range(ts):  # static trip count -> fully unrolled, static slices
        lo = t * b_sz
        h = jnp.tanh(
            xw[lo:lo + b_sz, :]
            + jnp.dot(h, w_hh, preferred_element_type=jnp.float32)
        )
        o_ref[lo:lo + b_sz, :] = h.astype(o_ref.dtype)
    h_ref[...] = h


def recurrent_forward(x, w_ih, w_hh, b_ih, b_hh, *, ts_chunk=None,
                      mxu_dtype=None):
    """Single-layer unidirectional tanh RNN forward, zero initial hidden.

    x: (S, B, D) seq-major input (PyTorch batch_first=False convention).
    w_ih: (D, H), w_hh: (H, H), b_ih/b_hh: (H,)
    mxu_dtype: optional dtype (e.g. jnp.bfloat16) for the chunk-projection
               MXU operands; accumulation stays f32.
    returns: (S, B, H)
    """
    S, B, D = x.shape
    H = w_hh.shape[0]
    assert w_ih.shape == (D, H)
    assert w_hh.shape == (H, H)

    if ts_chunk is None:
        # Largest divisor of S whose double-buffered x/out chunks stay inside
        # a conservative VMEM budget (safe for v7x's 64 MiB part as well).
        budget = 8 * 1024 * 1024

        def chunk_bytes(ts):
            return 2 * ts * B * (D + H) * x.dtype.itemsize

        ts_chunk = S
        while ts_chunk > 1 and (S % ts_chunk != 0
                                or chunk_bytes(ts_chunk) > budget):
            ts_chunk -= 1
    ts = min(ts_chunk, S)
    assert S % ts == 0, "sequence length must be a multiple of the time chunk"
    # TODO(synk): ragged S (tail-masking with pl.when) not handled.

    bias = (b_ih + b_hh).reshape(1, H).astype(jnp.float32)
    # Pre-flatten: 2-D lane-friendly blocks, no in-kernel reshape.
    x2d = x.reshape(S * B, D)

    kernel = functools.partial(_rnn_chunk_kernel, ts=ts, b_sz=B,
                               mxu_dtype=mxu_dtype)

    cost = pl.CostEstimate(
        flops=2 * S * B * (D + H) * H,
        transcendentals=S * B * H,
        bytes_accessed=(x.dtype.itemsize * S * B * (D + H)
                        + 4 * (D * H + H * H + H)),
    )

    out2d = pl.pallas_call(
        kernel,
        out_shape=jax.ShapeDtypeStruct((S * B, H), x.dtype),
        grid_spec=pltpu.PrefetchScalarGridSpec(
            num_scalar_prefetch=0,
            grid=(S // ts,),
            in_specs=[
                pl.BlockSpec((ts * B, D), lambda s: (s, 0)),
                # Loop-invariant operands (constant index_map -> no re-DMA).
                pl.BlockSpec((D, H), lambda s: (0, 0)),
                pl.BlockSpec((H, H), lambda s: (0, 0)),
                pl.BlockSpec((1, H), lambda s: (0, 0)),
            ],
            out_specs=pl.BlockSpec((ts * B, H), lambda s: (s, 0)),
            scratch_shapes=[
                pltpu.VMEM((B, H), jnp.float32),  # carried hidden state
            ],
        ),
        compiler_params=pltpu.CompilerParams(
            # Recurrence: hidden state carries across grid steps -> sequential.
            dimension_semantics=("arbitrary",),
        ),
        cost_estimate=cost,
    )(x2d, w_ih, w_hh, bias)

    return out2d.reshape(S, B, H)


if __name__ == "__main__":
    key = jax.random.PRNGKey(0)
    # seq=16, batch=8, d_in=64, d_hidden=128 (lane-aligned hidden dim).
    S, B, D, H = 16, 8, 64, 128
    k1, k2, k3, k4, k5 = jax.random.split(key, 5)
    scale = 1.0 / jnp.sqrt(H)

    x = jax.random.normal(k1, (S, B, D), dtype=jnp.float32)
    w_ih = jax.random.uniform(k2, (D, H), jnp.float32, -scale, scale)
    w_hh = jax.random.uniform(k3, (H, H), jnp.float32, -scale, scale)
    b_ih = jax.random.uniform(k4, (H,), jnp.float32, -scale, scale)
    b_hh = jax.random.uniform(k5, (H,), jnp.float32, -scale, scale)

    y = recurrent_forward(x, w_ih, w_hh, b_ih, b_hh)
    y = jax.block_until_ready(y)

    # Pure-JAX reference (nn.RNN tanh, 1 layer, unidirectional, zero hidden).
    def ref_rnn(x, w_ih, w_hh, b):
        def step(h, x_t):
            h_new = jnp.tanh(x_t @ w_ih + h @ w_hh + b)
            return h_new, h_new

        h0 = jnp.zeros((x.shape[1], w_hh.shape[0]), jnp.float32)
        _, ys = lax.scan(step, h0, x)
        return ys

    ref = ref_rnn(x, w_ih, w_hh, b_ih + b_hh)
    assert y.shape == (S, B, H)
    assert jnp.allclose(y, ref, atol=1e-5, rtol=1e-5), \
        "Pallas RNN mismatch vs reference (f32)"

    # Perf variant: bf16 MXU operands for the chunk projection (f32 accum).
    y_bf16 = recurrent_forward(x, w_ih, w_hh, b_ih, b_hh,
                               mxu_dtype=jnp.bfloat16)
    y_bf16 = jax.block_until_ready(y_bf16)
    assert float(jnp.max(jnp.abs(y_bf16 - ref))) < 0.1, \
        "Pallas RNN bf16 variant diverged"

    print("KERNEL_OK")
</pallas_src>

<mosaic_0001>
module attributes {stable_mosaic.version = 11 : i64} {
  func.func @_rnn_chunk_kernel(%arg0: i32, %arg1: memref<128x64xf32, #tpu.memory_space<vmem>>, %arg2: memref<64x128xf32, #tpu.memory_space<vmem>>, %arg3: memref<128x128xf32, #tpu.memory_space<vmem>>, %arg4: memref<1x128xf32, #tpu.memory_space<vmem>>, %arg5: memref<128x128xf32, #tpu.memory_space<vmem>>, %arg6: memref<8x128xf32, #tpu.memory_space<vmem>>) attributes {dimension_semantics = [#tpu.dimension_semantics<arbitrary>], iteration_bounds = array<i64: 1>, scalar_prefetch = 0 : i64, scratch_operands = 1 : i64, tpu.core_type = #tpu.core_type<tc>, window_params = [{transform_indices = @transform_0, window_bounds = array<i64: 128, 64>}, {pipeline_mode = #tpu.pipeline_mode<synchronous>, transform_indices = @transform_1, window_bounds = array<i64: 64, 128>}, {pipeline_mode = #tpu.pipeline_mode<synchronous>, transform_indices = @transform_2, window_bounds = array<i64: 128, 128>}, {pipeline_mode = #tpu.pipeline_mode<synchronous>, transform_indices = @transform_3, window_bounds = array<i64: 1, 128>}, {transform_indices = @transform_4, window_bounds = array<i64: 128, 128>}]} {
    %c0_i32 = arith.constant 0 : i32
    %0 = arith.cmpi eq, %arg0, %c0_i32 : i32
    %1 = arith.extui %0 : i1 to i32
    %c0_i32_0 = arith.constant 0 : i32
    %2 = arith.cmpi ne, %1, %c0_i32_0 : i32
    scf.if %2 {
      %cst_45 = arith.constant 0.000000e+00 : f32
      %92 = vector.broadcast %cst_45 : f32 to vector<8x128xf32>
      %c0_46 = arith.constant 0 : index
      %c0_47 = arith.constant 0 : index
      %93 = vector.load %arg6[%c0_46, %c0_47] : memref<8x128xf32, #tpu.memory_space<vmem>>, vector<8x128xf32>
      tpu.vector_store %arg6[%c0_46, %c0_47], %92 {strides = array<i32>} : memref<8x128xf32, #tpu.memory_space<vmem>>, vector<8x128xf32>,
    } else {
    }
    %c0 = arith.constant 0 : index
    %c0_1 = arith.constant 0 : index
    %3 = vector.load %arg1[%c0, %c0_1] : memref<128x64xf32, #tpu.memory_space<vmem>>, vector<128x64xf32>
    %c0_2 = arith.constant 0 : index
    %c0_3 = arith.constant 0 : index
    %4 = vector.load %arg2[%c0_2, %c0_3] : memref<64x128xf32, #tpu.memory_space<vmem>>, vector<64x128xf32>
    %cst = arith.constant dense<0.000000e+00> : vector<128x128xf32>
    %5 = tpu.matmul %3, %4, %cst {dimension_numbers = #tpu.dot_dimension_numbers<[1], [0], [0], [1], [0, 0, 1, 1], [], []>} : vector<128x64xf32>, vector<64x128xf32>, vector<128x128xf32> -> vector<128x128xf32>
    %c0_4 = arith.constant 0 : index
    %c0_5 = arith.constant 0 : index
    %6 = vector.load %arg4[%c0_4, %c0_5] : memref<1x128xf32, #tpu.memory_space<vmem>>, vector<1x128xf32>
    %7 = vector.broadcast %6 : vector<1x128xf32> to vector<128x128xf32>
    %8 = arith.addf %5, %7 : vector<128x128xf32>
    %c0_6 = arith.constant 0 : index
    %c0_7 = arith.constant 0 : index
    %9 = vector.load %arg3[%c0_6, %c0_7] : memref<128x128xf32, #tpu.memory_space<vmem>>, vector<128x128xf32>
    %c0_8 = arith.constant 0 : index
    %c0_9 = arith.constant 0 : index
    %10 = vector.load %arg6[%c0_8, %c0_9] : memref<8x128xf32, #tpu.memory_space<vmem>>, vector<8x128xf32>
    %11 = vector.extract_strided_slice %8 {offsets = [0, 0], sizes = [8, 128], strides = [1, 1]} : vector<128x128xf32> to vector<8x128xf32>
    %cst_10 = arith.constant dense<0.000000e+00> : vector<8x128xf32>
    %12 = tpu.matmul %10, %9, %cst_10 {dimension_numbers = #tpu.dot_dimension_numbers<[1], [0], [0], [1], [0, 0, 1, 1], [], []>} : vector<8x128xf32>, vector<128x128xf32>, vector<8x128xf32> -> vector<8x128xf32>
    %13 = arith.addf %11, %12 : vector<8x128xf32>
    %14 = math.tanh %13 : vector<8x128xf32>
    %c0_11 = arith.constant 0 : index
    %c0_12 = arith.constant 0 : index
    %15 = vector.load %arg5[%c0_11, %c0_12] : memref<128x128xf32, #tpu.memory_space<vmem>>, vector<8x128xf32>
    tpu.vector_store %arg5[%c0_11, %c0_12], %14 {strides = array<i32>} : memref<128x128xf32, #tpu.memory_space<vmem>>, vector<8x128xf32>,
    %16 = vector.extract_strided_slice %8 {offsets = [8, 0], sizes = [8, 128], strides = [1, 1]} : vector<128x128xf32> to vector<8x128xf32>
    %cst_13 = arith.constant dense<0.000000e+00> : vector<8x128xf32>
    %17 = tpu.matmul %14, %9, %cst_13 {dimension_numbers = #tpu.dot_dimension_numbers<[1], [0], [0], [1], [0, 0, 1, 1], [], []>} : vector<8x128xf32>, vector<128x128xf32>, vector<8x128xf32> -> vector<8x128xf32>
    %18 = arith.addf %16, %17 : vector<8x128xf32>
    %19 = math.tanh %18 : vector<8x128xf32>
    %c8 = arith.constant 8 : index
    %c0_14 = arith.constant 0 : index
    %20 = vector.load %arg5[%c8, %c0_14] : memref<128x128xf32, #tpu.memory_space<vmem>>, vector<8x128xf32>
    tpu.vector_store %arg5[%c8, %c0_14], %19 {strides = array<i32>} : memref<128x128xf32, #tpu.memory_space<vmem>>, vector<8x128xf32>,
    %21 = vector.extract_strided_slice %8 {offsets = [16, 0], sizes = [8, 128], strides = [1, 1]} : vector<128x128xf32> to vector<8x128xf32>
    %cst_15 = arith.constant dense<0.000000e+00> : vector<8x128xf32>
    %22 = tpu.matmul %19, %9, %cst_15 {dimension_numbers = #tpu.dot_dimension_numbers<[1], [0], [0], [1], [0, 0, 1, 1], [], []>} : vector<8x128xf32>, vector<128x128xf32>, vector<8x128xf32> -> vector<8x128xf32>
    %23 = arith.addf %21, %22 : vector<8x128xf32>
    %24 = math.tanh %23 : vector<8x128xf32>
    %c16 = arith.constant 16 : index
    %c0_16 = arith.constant 0 : index
    %25 = vector.load %arg5[%c16, %c0_16] : memref<128x128xf32, #tpu.memory_space<vmem>>, vector<8x128xf32>
    tpu.vector_store %arg5[%c16, %c0_16], %24 {strides = array<i32>} : memref<128x128xf32, #tpu.memory_space<vmem>>, vector<8x128xf32>,
    %26 = vector.extract_strided_slice %8 {offsets = [24, 0], sizes = [8, 128], strides = [1, 1]} : vector<128x128xf32> to vector<8x128xf32>
    %cst_17 = arith.constant dense<0.000000e+00> : vector<8x128xf32>
    %27 = tpu.matmul %24, %9, %cst_17 {dimension_numbers = #tpu.dot_dimension_numbers<[1], [0], [0], [1], [0, 0, 1, 1], [], []>} : vector<8x128xf32>, vector<128x128xf32>, vector<8x128xf32> -> vector<8x128xf32>
    %28 = arith.addf %26, %27 : vector<8x128xf32>
    %29 = math.tanh %28 : vector<8x128xf32>
    %c24 = arith.constant 24 : index
    %c0_18 = arith.constant 0 : index
    %30 = vector.load %arg5[%c24, %c0_18] : memref<128x128xf32, #tpu.memory_space<vmem>>, vector<8x128xf32>
    tpu.vector_store %arg5[%c24, %c0_18], %29 {strides = array<i32>} : memref<128x128xf32, #tpu.memory_space<vmem>>, vector<8x128xf32>,
    %31 = vector.extract_strided_slice %8 {offsets = [32, 0], sizes = [8, 128], strides = [1, 1]} : vector<128x128xf32> to vector<8x128xf32>
    %cst_19 = arith.constant dense<0.000000e+00> : vector<8x128xf32>
    %32 = tpu.matmul %29, %9, %cst_19 {dimension_numbers = #tpu.dot_dimension_numbers<[1], [0], [0], [1], [0, 0, 1, 1], [], []>} : vector<8x128xf32>, vector<128x128xf32>, vector<8x128xf32> -> vector<8x128xf32>
    %33 = arith.addf %31, %32 : vector<8x128xf32>
    %34 = math.tanh %33 : vector<8x128xf32>
    %c32 = arith.constant 32 : index
    %c0_20 = arith.constant 0 : index
    %35 = vector.load %arg5[%c32, %c0_20] : memref<128x128xf32, #tpu.memory_space<vmem>>, vector<8x128xf32>
    tpu.vector_store %arg5[%c32, %c0_20], %34 {strides = array<i32>} : memref<128x128xf32, #tpu.memory_space<vmem>>, vector<8x128xf32>,
    %36 = vector.extract_strided_slice %8 {offsets = [40, 0], sizes = [8, 128], strides = [1, 1]} : vector<128x128xf32> to vector<8x128xf32>
    %cst_21 = arith.constant dense<0.000000e+00> : vector<8x128xf32>
    %37 = tpu.matmul %34, %9, %cst_21 {dimension_numbers = #tpu.dot_dimension_numbers<[1], [0], [0], [1], [0, 0, 1, 1], [], []>} : vector<8x128xf32>, vector<128x128xf32>, vector<8x128xf32> -> vector<8x128xf32>
    %38 = arith.addf %36, %37 : vector<8x128xf32>
    %39 = math.tanh %38 : vector<8x128xf32>
    %c40 = arith.constant 40 : index
    %c0_22 = arith.constant 0 : index
    %40 = vector.load %arg5[%c40, %c0_22] : memref<128x128xf32, #tpu.memory_space<vmem>>, vector<8x128xf32>
    tpu.vector_store %arg5[%c40, %c0_22], %39 {strides = array<i32>} : memref<128x128xf32, #tpu.memory_space<vmem>>, vector<8x128xf32>,
    %41 = vector.extract_strided_slice %8 {offsets = [48, 0], sizes = [8, 128], strides = [1, 1]} : vector<128x128xf32> to vector<8x128xf32>
    %cst_23 = arith.constant dense<0.000000e+00> : vector<8x128xf32>
    %42 = tpu.matmul %39, %9, %cst_23 {dimension_numbers = #tpu.dot_dimension_numbers<[1], [0], [0], [1], [0, 0, 1, 1], [], []>} : vector<8x128xf32>, vector<128x128xf32>, vector<8x128xf32> -> vector<8x128xf32>
    %43 = arith.addf %41, %42 : vector<8x128xf32>
    %44 = math.tanh %43 : vector<8x128xf32>
    %c48 = arith.constant 48 : index
    %c0_24 = arith.constant 0 : index
    %45 = vector.load %arg5[%c48, %c0_24] : memref<128x128xf32, #tpu.memory_space<vmem>>, vector<8x128xf32>
    tpu.vector_store %arg5[%c48, %c0_24], %44 {strides = array<i32>} : memref<128x128xf32, #tpu.memory_space<vmem>>, vector<8x128xf32>,
    %46 = vector.extract_strided_slice %8 {offsets = [56, 0], sizes = [8, 128], strides = [1, 1]} : vector<128x128xf32> to vector<8x128xf32>
    %cst_25 = arith.constant dense<0.000000e+00> : vector<8x128xf32>
    %47 = tpu.matmul %44, %9, %cst_25 {dimension_numbers = #tpu.dot_dimension_numbers<[1], [0], [0], [1], [0, 0, 1, 1], [], []>} : vector<8x128xf32>, vector<128x128xf32>, vector<8x128xf32> -> vector<8x128xf32>
    %48 = arith.addf %46, %47 : vector<8x128xf32>
    %49 = math.tanh %48 : vector<8x128xf32>
    %c56 = arith.constant 56 : index
    %c0_26 = arith.constant 0 : index
    %50 = vector.load %arg5[%c56, %c0_26] : memref<128x128xf32, #tpu.memory_space<vmem>>, vector<8x128xf32>
    tpu.vector_store %arg5[%c56, %c0_26], %49 {strides = array<i32>} : memref<128x128xf32, #tpu.memory_space<vmem>>, vector<8x128xf32>,
    %51 = vector.extract_strided_slice %8 {offsets = [64, 0], sizes = [8, 128], strides = [1, 1]} : vector<128x128xf32> to vector<8x128xf32>
    %cst_27 = arith.constant dense<0.000000e+00> : vector<8x128xf32>
    %52 = tpu.matmul %49, %9, %cst_27 {dimension_numbers = #tpu.dot_dimension_numbers<[1], [0], [0], [1], [0, 0, 1, 1], [], []>} : vector<8x128xf32>, vector<128x128xf32>, vector<8x128xf32> -> vector<8x128xf32>
    %53 = arith.addf %51, %52 : vector<8x128xf32>
    %54 = math.tanh %53 : vector<8x128xf32>
    %c64 = arith.constant 64 : index
    %c0_28 = arith.constant 0 : index
    %55 = vector.load %arg5[%c64, %c0_28] : memref<128x128xf32, #tpu.memory_space<vmem>>, vector<8x128xf32>
    tpu.vector_store %arg5[%c64, %c0_28], %54 {strides = array<i32>} : memref<128x128xf32, #tpu.memory_space<vmem>>, vector<8x128xf32>,
    %56 = vector.extract_strided_slice %8 {offsets = [72, 0], sizes = [8, 128], strides = [1, 1]} : vector<128x128xf32> to vector<8x128xf32>
    %cst_29 = arith.constant dense<0.000000e+00> : vector<8x128xf32>
    %57 = tpu.matmul %54, %9, %cst_29 {dimension_numbers = #tpu.dot_dimension_numbers<[1], [0], [0], [1], [0, 0, 1, 1], [], []>} : vector<8x128xf32>, vector<128x128xf32>, vector<8x128xf32> -> vector<8x128xf32>
    %58 = arith.addf %56, %57 : vector<8x128xf32>
    %59 = math.tanh %58 : vector<8x128xf32>
    %c72 = arith.constant 72 : index
    %c0_30 = arith.constant 0 : index
    %60 = vector.load %arg5[%c72, %c0_30] : memref<128x128xf32, #tpu.memory_space<vmem>>, vector<8x128xf32>
    tpu.vector_store %arg5[%c72, %c0_30], %59 {strides = array<i32>} : memref<128x128xf32, #tpu.memory_space<vmem>>, vector<8x128xf32>,
    %61 = vector.extract_strided_slice %8 {offsets = [80, 0], sizes = [8, 128], strides = [1, 1]} : vector<128x128xf32> to vector<8x128xf32>
    %cst_31 = arith.constant dense<0.000000e+00> : vector<8x128xf32>
    %62 = tpu.matmul %59, %9, %cst_31 {dimension_numbers = #tpu.dot_dimension_numbers<[1], [0], [0], [1], [0, 0, 1, 1], [], []>} : vector<8x128xf32>, vector<128x128xf32>, vector<8x128xf32> -> vector<8x128xf32>
    %63 = arith.addf %61, %62 : vector<8x128xf32>
    %64 = math.tanh %63 : vector<8x128xf32>
    %c80 = arith.constant 80 : index
    %c0_32 = arith.constant 0 : index
    %65 = vector.load %arg5[%c80, %c0_32] : memref<128x128xf32, #tpu.memory_space<vmem>>, vector<8x128xf32>
    tpu.vector_store %arg5[%c80, %c0_32], %64 {strides = array<i32>} : memref<128x128xf32, #tpu.memory_space<vmem>>, vector<8x128xf32>,
    %66 = vector.extract_strided_slice %8 {offsets = [88, 0], sizes = [8, 128], strides = [1, 1]} : vector<128x128xf32> to vector<8x128xf32>
    %cst_33 = arith.constant dense<0.000000e+00> : vector<8x128xf32>
    %67 = tpu.matmul %64, %9, %cst_33 {dimension_numbers = #tpu.dot_dimension_numbers<[1], [0], [0], [1], [0, 0, 1, 1], [], []>} : vector<8x128xf32>, vector<128x128xf32>, vector<8x128xf32> -> vector<8x128xf32>
    %68 = arith.addf %66, %67 : vector<8x128xf32>
    %69 = math.tanh %68 : vector<8x128xf32>
    %c88 = arith.constant 88 : index
    %c0_34 = arith.constant 0 : index
    %70 = vector.load %arg5[%c88, %c0_34] : memref<128x128xf32, #tpu.memory_space<vmem>>, vector<8x128xf32>
    tpu.vector_store %arg5[%c88, %c0_34], %69 {strides = array<i32>} : memref<128x128xf32, #tpu.memory_space<vmem>>, vector<8x128xf32>,
    %71 = vector.extract_strided_slice %8 {offsets = [96, 0], sizes = [8, 128], strides = [1, 1]} : vector<128x128xf32> to vector<8x128xf32>
    %cst_35 = arith.constant dense<0.000000e+00> : vector<8x128xf32>
    %72 = tpu.matmul %69, %9, %cst_35 {dimension_numbers = #tpu.dot_dimension_numbers<[1], [0], [0], [1], [0, 0, 1, 1], [], []>} : vector<8x128xf32>, vector<128x128xf32>, vector<8x128xf32> -> vector<8x128xf32>
    %73 = arith.addf %71, %72 : vector<8x128xf32>
    %74 = math.tanh %73 : vector<8x128xf32>
    %c96 = arith.constant 96 : index
    %c0_36 = arith.constant 0 : index
    %75 = vector.load %arg5[%c96, %c0_36] : memref<128x128xf32, #tpu.memory_space<vmem>>, vector<8x128xf32>
    tpu.vector_store %arg5[%c96, %c0_36], %74 {strides = array<i32>} : memref<128x128xf32, #tpu.memory_space<vmem>>, vector<8x128xf32>,
    %76 = vector.extract_strided_slice %8 {offsets = [104, 0], sizes = [8, 128], strides = [1, 1]} : vector<128x128xf32> to vector<8x128xf32>
    %cst_37 = arith.constant dense<0.000000e+00> : vector<8x128xf32>
    %77 = tpu.matmul %74, %9, %cst_37 {dimension_numbers = #tpu.dot_dimension_numbers<[1], [0], [0], [1], [0, 0, 1, 1], [], []>} : vector<8x128xf32>, vector<128x128xf32>, vector<8x128xf32> -> vector<8x128xf32>
    %78 = arith.addf %76, %77 : vector<8x128xf32>
    %79 = math.tanh %78 : vector<8x128xf32>
    %c104 = arith.constant 104 : index
    %c0_38 = arith.constant 0 : index
    %80 = vector.load %arg5[%c104, %c0_38] : memref<128x128xf32, #tpu.memory_space<vmem>>, vector<8x128xf32>
    tpu.vector_store %arg5[%c104, %c0_38], %79 {strides = array<i32>} : memref<128x128xf32, #tpu.memory_space<vmem>>, vector<8x128xf32>,
    %81 = vector.extract_strided_slice %8 {offsets = [112, 0], sizes = [8, 128], strides = [1, 1]} : vector<128x128xf32> to vector<8x128xf32>
    %cst_39 = arith.constant dense<0.000000e+00> : vector<8x128xf32>
    %82 = tpu.matmul %79, %9, %cst_39 {dimension_numbers = #tpu.dot_dimension_numbers<[1], [0], [0], [1], [0, 0, 1, 1], [], []>} : vector<8x128xf32>, vector<128x128xf32>, vector<8x128xf32> -> vector<8x128xf32>
    %83 = arith.addf %81, %82 : vector<8x128xf32>
    %84 = math.tanh %83 : vector<8x128xf32>
    %c112 = arith.constant 112 : index
    %c0_40 = arith.constant 0 : index
    %85 = vector.load %arg5[%c112, %c0_40] : memref<128x128xf32, #tpu.memory_space<vmem>>, vector<8x128xf32>
    tpu.vector_store %arg5[%c112, %c0_40], %84 {strides = array<i32>} : memref<128x128xf32, #tpu.memory_space<vmem>>, vector<8x128xf32>,
    %86 = vector.extract_strided_slice %8 {offsets = [120, 0], sizes = [8, 128], strides = [1, 1]} : vector<128x128xf32> to vector<8x128xf32>
    %cst_41 = arith.constant dense<0.000000e+00> : vector<8x128xf32>
    %87 = tpu.matmul %84, %9, %cst_41 {dimension_numbers = #tpu.dot_dimension_numbers<[1], [0], [0], [1], [0, 0, 1, 1], [], []>} : vector<8x128xf32>, vector<128x128xf32>, vector<8x128xf32> -> vector<8x128xf32>
    %88 = arith.addf %86, %87 : vector<8x128xf32>
    %89 = math.tanh %88 : vector<8x128xf32>
    %c120 = arith.constant 120 : index
    %c0_42 = arith.constant 0 : index
    %90 = vector.load %arg5[%c120, %c0_42] : memref<128x128xf32, #tpu.memory_space<vmem>>, vector<8x128xf32>
    tpu.vector_store %arg5[%c120, %c0_42], %89 {strides = array<i32>} : memref<128x128xf32, #tpu.memory_space<vmem>>, vector<8x128xf32>,
    %c0_43 = arith.constant 0 : index
    %c0_44 = arith.constant 0 : index
    %91 = vector.load %arg6[%c0_43, %c0_44] : memref<8x128xf32, #tpu.memory_space<vmem>>, vector<8x128xf32>
    tpu.vector_store %arg6[%c0_43, %c0_44], %89 {strides = array<i32>} : memref<8x128xf32, #tpu.memory_space<vmem>>, vector<8x128xf32>,
    return
  }
  func.func @transform_0(%arg0: i32) -> (i32, i32) {
    %c0_i32 = arith.constant 0 : i32
    %c0_i32_0 = arith.constant 0 : i32
    return %arg0, %c0_i32 : i32, i32
  }
  func.func @transform_1(%arg0: i32) -> (i32, i32) {
    %c0_i32 = arith.constant 0 : i32
    %c0_i32_0 = arith.constant 0 : i32
    %c0_i32_1 = arith.constant 0 : i32
    return %c0_i32, %c0_i32_0 : i32, i32
  }
  func.func @transform_2(%arg0: i32) -> (i32, i32) {
    %c0_i32 = arith.constant 0 : i32
    %c0_i32_0 = arith.constant 0 : i32
    %c0_i32_1 = arith.constant 0 : i32
    return %c0_i32, %c0_i32_0 : i32, i32
  }
  func.func @transform_3(%arg0: i32) -> (i32, i32) {
    %c0_i32 = arith.constant 0 : i32
    %c0_i32_0 = arith.constant 0 : i32
    %c0_i32_1 = arith.constant 0 : i32
    return %c0_i32, %c0_i32_0 : i32, i32
  }
  func.func @transform_4(%arg0: i32) -> (i32, i32) {
    %c0_i32 = arith.constant 0 : i32
    %c0_i32_0 = arith.constant 0 : i32
    return %arg0, %c0_i32 : i32, i32
  }
}

</mosaic_0001>

<bundles_post_ra>
// kernel: tpu_custom_call.1
= control target key start
LH: loop header
LB: loop body
LE: loop exit
PB: predicated region body
PF: predicated region fallthrough
CT: control target
= control target key end

     0   :  { %v2439_v1 = vmov 0.0   ;;  %vm2440_vm0 = vmmov 0   ;;  %s3325_s0 = inlined_call_operand.vmem [shape: f32[128,64], index: 0, kind: input, shape index: {}]   ;;  %s3326_s1 = inlined_call_operand.vmem [shape: f32[64,128], index: 1, kind: input, shape index: {}]   ;;  %s3327_s2 = inlined_call_operand.vmem [shape: f32[128,128], index: 2, kind: input, shape index: {}]   ;;  %s3328_s3 = inlined_call_operand.vmem [shape: f32[1,128], index: 3, kind: input, shape index: {}]   ;;  %s3329_s4 = inlined_call_operand.hbm [shape: f32[128,128], index: 4, kind: output, shape index: {}]  }
   0x1   :  { %v2472_v0 = vld [vmem:[%s3327_s2 + $0x78] sm:$0xff]  ;;  %1803 = vmatprep.subr.mxu1 %v2439_v1  ;;  %v2478_v2 = vld [vmem:[%s3327_s2 + $0x70] sm:$0xff]  ;;  %1835 = vmatprep.mubr.msk.f32.mxu1 %vm2440_vm0, %v2439_v1  ;;  %v2493_v5 = vld [vmem:[%s3327_s2 + $0x68] sm:$0xff] }
   0x2   :  { %v46_v3 = vld [vmem:[%s3326_s1 + $0x38] sm:$0xff]  ;;  %1804 = vmatpush3.msra.mxu1 %v2472_v0  ;;  %v45_v4 = vld [vmem:[%s3326_s1 + $0x30] sm:$0xff]  ;;  %v44_v6 = vld [vmem:[%s3326_s1 + $0x28] sm:$0xff] }
   0x3   :  { %1763 = vmatprep.subr.mxu0 %v46_v3  ;;  %1805 = vmatprep.subr.mxu1 %v2439_v1  ;;  %v2503_v7 = vld [vmem:[%s3327_s2 + $0x60] sm:$0xff]  ;;  %v2513_v9 = vld [vmem:[%s3327_s2 + $0x58] sm:$0xff]  ;;  %v2523_v11 = vld [vmem:[%s3327_s2 + $0x50] sm:$0xff] }
   0x4   :  { %1764 = vmatpush3.msra.mxu0 %v46_v3  ;;  %1806 = vmatpush3.msra.mxu1 %v2478_v2  ;;  %v43_v8 = vld [vmem:[%s3326_s1 + $0x20] sm:$0xff]  ;;  %v42_v10 = vld [vmem:[%s3326_s1 + $0x18] sm:$0xff]  ;;  %v41_v12 = vld [vmem:[%s3326_s1 + $0x10] sm:$0xff] }
   0x5   :  { %1765 = vmatprep.subr.mxu0 %v45_v4  ;;  %1807 = vmatprep.subr.mxu1 %v2439_v1 }
   0x6   :  { %1766 = vmatpush3.msra.mxu0 %v45_v4  ;;  %1808 = vmatpush3.msra.mxu1 %v2493_v5 }
   0x7   :  { %1767 = vmatprep.subr.mxu0 %v44_v6  ;;  %1809 = vmatprep.subr.mxu1 %v2439_v1 }
   0x8   :  { %1768 = vmatpush3.msra.mxu0 %v44_v6  ;;  %1810 = vmatpush3.msra.mxu1 %v2503_v7 }
   0x9   :  { %1769 = vmatprep.subr.mxu0 %v43_v8  ;;  %1811 = vmatprep.subr.mxu1 %v2439_v1 }
   0xa   :  { %1770 = vmatpush3.msra.mxu0 %v43_v8  ;;  %1812 = vmatpush3.msra.mxu1 %v2513_v9 }
   0xb   :  { %1771 = vmatprep.subr.mxu0 %v42_v10 }
   0xc   :  { %9 = vsyncpa [#allocation4], 0  ;;  %1813 = vmatprep.subr.mxu1 %v2439_v1  ;;  %v2533_v13 = vld [vmem:[%s3327_s2 + $0x48] sm:$0xff]  ;;  %1772 = vmatpush3.msra.mxu0 %v42_v10  ;;  %v2543_v15 = vld [vmem:[%s3327_s2 + $0x40] sm:$0xff]  ;;  %vm54_vm1 = vcmask 523264  }
   0xd   :  { %v40_v14 = vld [vmem:[%s3326_s1 + $0x8] sm:$0xff]  ;;  %1814 = vmatpush3.msra.mxu1 %v2523_v11  ;;  %1773 = vmatprep.subr.mxu0 %v41_v12  ;;  %v39_v16 = vld [vmem:[%s3326_s1] sm:$0xff]  ;;  %v2553_v17 = vld [vmem:[%s3327_s2 + $0x38] sm:$0xff] }
   0xe   :  { %1815 = vmatprep.subr.mxu1 %v2439_v1  ;;  %1774 = vmatpush3.msra.mxu0 %v41_v12  ;;  %v23_v18 = vld [vmem:[%s3325_s0] sm:$0xff]  ;;  %v24_v19 = vld [vmem:[%s3325_s0 + $0x8] sm:$0xff]  ;;  %v2566_v20 = vld [vmem:[%s3327_s2 + $0x30] sm:$0xff] }
   0xf   :  { %1816 = vmatpush3.msra.mxu1 %v2533_v13  ;;  %1775 = vmatprep.subr.mxu0 %v40_v14  ;;  %v2574_v21 = vld [vmem:[%s3327_s2 + $0x28] sm:$0xff]  ;;  %v25_v22 = vld [vmem:[%s3325_s0 + $0x10] sm:$0xff]  ;;  %v2586_v23 = vld [vmem:[%s3327_s2 + $0x20] sm:$0xff] }
  0x10   :  { %1817 = vmatprep.subr.mxu1 %v2439_v1  ;;  %1776 = vmatpush3.msra.mxu0 %v40_v14  ;;  %v26_v24 = vld [vmem:[%s3325_s0 + $0x18] sm:$0xff]  ;;  %v2607_v26 = vld [vmem:[%s3327_s2 + $0x10] sm:$0xff]  ;;  %v27_v27 = vld [vmem:[%s3325_s0 + $0x20] sm:$0xff] }
  0x11   :  { %1818 = vmatpush3.msra.mxu1 %v2543_v15  ;;  %1777 = vmatprep.subr.mxu0 %v39_v16  ;;  %v2598_v25 = vld [vmem:[%s3327_s2 + $0x18] sm:$0xff]  ;;  %v2619_v28 = vld [vmem:[%s3327_s2 + $0x8] sm:$0xff]  ;;  %v2631_v30 = vld [vmem:[%s3327_s2] sm:$0xff] }
  0x12   :  { %1819 = vmatprep.subr.mxu1 %v2439_v1  ;;  %1778 = vmatpush3.msra.mxu0 %v39_v16  ;;  %v28_v29 = vld [vmem:[%s3325_s0 + $0x28] sm:$0xff]  ;;  %v29_v31 = vld [vmem:[%s3325_s0 + $0x30] sm:$0xff]  ;;  %v30_v32 = vld [vmem:[%s3325_s0 + $0x38] sm:$0xff] }
  0x13   :  { %1820 = vmatpush3.msra.mxu1 %v2553_v17  ;;  %1779 = vmatprep.mubr.msk.f32.mxu0 %vm54_vm1, %v23_v18  ;;  %v31_v33 = vld [vmem:[%s3325_s0 + $0x40] sm:$0xff]  ;;  %v32_v34 = vld [vmem:[%s3325_s0 + $0x48] sm:$0xff]  ;;  %v33_v35 = vld [vmem:[%s3325_s0 + $0x50] sm:$0xff] }
  0x14   :  { %1821 = vmatprep.subr.mxu1 %v2439_v1  ;;  %1780 = vmatmul.mubr.msk.f32.vlgmr.msra.gmra.mxu0 %vm54_vm1, %v24_v19  ;;  %v34_v36 = vld [vmem:[%s3325_s0 + $0x58] sm:$0xff]  ;;  %v35_v37 = vld [vmem:[%s3325_s0 + $0x60] sm:$0xff]  ;;  %v36_v38 = vld [vmem:[%s3325_s0 + $0x68] sm:$0xff] }
  0x15   :  { %1822 = vmatpush3.msra.mxu1 %v2566_v20  ;;  %1838 = vmatprep.subr.mxu0 %v2439_v1  ;;  %v37_v39 = vld [vmem:[%s3325_s0 + $0x70] sm:$0xff]  ;;  %v38_v40 = vld [vmem:[%s3325_s0 + $0x78] sm:$0xff]  ;;  %v2745_v42 = vld [vmem:[%s3328_s3] ss:$0 sm:$0xff] }
  0x16   :  { %1823 = vmatprep.subr.mxu1 %v2439_v1  ;;  %1839 = vmatpush3.msra.mxu0 %v2472_v0 }
  0x17   :  { %1824 = vmatpush3.msra.mxu1 %v2574_v21  ;;  %1782 = vmatprep.mubr.msk.f32.mxu0 %vm54_vm1, %v25_v22 }
  0x18   :  { %1825 = vmatprep.subr.mxu1 %v2439_v1  ;;  %1840 = vmatprep.subr.mxu0 %v2439_v1 }
  0x19   :  { %1826 = vmatpush3.msra.mxu1 %v2586_v23  ;;  %1783 = vmatmul.mubr.msk.f32.gmra.mxu0 %vm54_vm1, %v26_v24 }
  0x1a   :  { %1827 = vmatprep.subr.mxu1 %v2439_v1  ;;  %1841 = vmatpush3.msra.mxu0 %v2478_v2 }
  0x1b   :  { %1828 = vmatpush3.msra.mxu1 %v2598_v25  ;;  %1842 = vmatprep.subr.mxu0 %v2439_v1 }
  0x1c   :  { %1829 = vmatprep.subr.mxu1 %v2439_v1  ;;  %1843 = vmatpush3.msra.mxu0 %v2493_v5 }
  0x1d   :  { %1830 = vmatpush3.msra.mxu1 %v2607_v26  ;;  %1785 = vmatprep.mubr.msk.f32.mxu0 %vm54_vm1, %v27_v27 }
  0x1e   :  { %1831 = vmatprep.subr.mxu1 %v2439_v1  ;;  %1844 = vmatprep.subr.mxu0 %v2439_v1 }
  0x1f   :  { %1832 = vmatpush3.msra.mxu1 %v2619_v28  ;;  %1786 = vmatmul.mubr.msk.f32.gmra.mxu0 %vm54_vm1, %v28_v29 }
  0x20   :  { %1833 = vmatprep.subr.mxu1 %v2439_v1  ;;  %1845 = vmatpush3.msra.mxu0 %v2503_v7 }
  0x21   :  { %1834 = vmatpush3.msra.mxu1 %v2631_v30  ;;  %1846 = vmatprep.subr.mxu0 %v2439_v1 }
  0x22   :  { %1836 = vmatmul.mubr.f32.vlgmr.msra.gmra.mxu1 %v2439_v1  ;;  %1847 = vmatpush3.msra.mxu0 %v2513_v9 }
  0x23   :  { %1848 = vmatprep.subr.mxu0 %v2439_v1  ;;  %1873 = vmatprep.subr.mxu1 %v2439_v1 }
  0x24   :  { %1849 = vmatpush3.msra.mxu0 %v2523_v11  ;;  %1874 = vmatpush3.msra.mxu1 %v2472_v0 }
  0x25   :  { %1850 = vmatprep.subr.mxu0 %v2439_v1  ;;  %1875 = vmatprep.subr.mxu1 %v2439_v1 }
  0x26   :  { %1851 = vmatpush3.msra.mxu0 %v2533_v13  ;;  %1876 = vmatpush3.msra.mxu1 %v2478_v2 }
  0x27   :  { %1852 = vmatprep.subr.mxu0 %v2439_v1  ;;  %1877 = vmatprep.subr.mxu1 %v2439_v1 }
  0x28   :  { %1853 = vmatpush3.msra.mxu0 %v2543_v15  ;;  %1878 = vmatpush3.msra.mxu1 %v2493_v5 }
  0x29   :  { %1854 = vmatprep.subr.mxu0 %v2439_v1  ;;  %1879 = vmatprep.subr.mxu1 %v2439_v1 }
  0x2a   :  { %1855 = vmatpush3.msra.mxu0 %v2553_v17  ;;  %1880 = vmatpush3.msra.mxu1 %v2503_v7 }
  0x2b   :  { %1856 = vmatprep.subr.mxu0 %v2439_v1  ;;  %1881 = vmatprep.subr.mxu1 %v2439_v1 }
  0x2c   :  { %1857 = vmatpush3.msra.mxu0 %v2566_v20  ;;  %1882 = vmatpush3.msra.mxu1 %v2513_v9 }
  0x2d   :  { %1858 = vmatprep.subr.mxu0 %v2439_v1  ;;  %1883 = vmatprep.subr.mxu1 %v2439_v1 }
  0x2e   :  { %1859 = vmatpush3.msra.mxu0 %v2574_v21  ;;  %1884 = vmatpush3.msra.mxu1 %v2523_v11 }
  0x2f   :  { %1860 = vmatprep.subr.mxu0 %v2439_v1  ;;  %1885 = vmatprep.subr.mxu1 %v2439_v1 }
  0x30   :  { %1861 = vmatpush3.msra.mxu0 %v2586_v23  ;;  %1886 = vmatpush3.msra.mxu1 %v2533_v13 }
  0x31   :  { %1862 = vmatprep.subr.mxu0 %v2439_v1  ;;  %1887 = vmatprep.subr.mxu1 %v2439_v1 }
  0x32   :  { %1863 = vmatpush3.msra.mxu0 %v2598_v25  ;;  %1888 = vmatpush3.msra.mxu1 %v2543_v15 }
  0x33   :  { %1864 = vmatprep.subr.mxu0 %v2439_v1  ;;  %1889 = vmatprep.subr.mxu1 %v2439_v1 }
  0x34   :  { %1865 = vmatpush3.msra.mxu0 %v2607_v26  ;;  %1890 = vmatpush3.msra.mxu1 %v2553_v17 }
  0x35   :  { %1866 = vmatprep.subr.mxu0 %v2439_v1  ;;  %1891 = vmatprep.subr.mxu1 %v2439_v1 }
  0x36   :  { %1867 = vmatpush3.msra.mxu0 %v2619_v28  ;;  %1892 = vmatpush3.msra.mxu1 %v2566_v20 }
  0x37   :  { %1868 = vmatprep.subr.mxu0 %v2439_v1  ;;  %1893 = vmatprep.subr.mxu1 %v2439_v1 }
  0x38   :  { %1869 = vmatpush3.msra.mxu0 %v2631_v30  ;;  %1894 = vmatpush3.msra.mxu1 %v2574_v21 }
  0x39   :  { %1895 = vmatprep.subr.mxu1 %v2439_v1  ;;  %1905 = vmatprep.mubr.msk.f32.mxu1 %vm2440_vm0, %v2439_v1 }
  0x3a   :  { %1896 = vmatpush3.msra.mxu1 %v2586_v23  ;;  %1908 = vmatprep.subr.mxu0 %v2439_v1 }
  0x3b   :  { %1897 = vmatprep.subr.mxu1 %v2439_v1  ;;  %1788 = vmatprep.mubr.msk.f32.mxu0 %vm54_vm1, %v29_v31 }
  0x3c   :  { %1898 = vmatpush3.msra.mxu1 %v2598_v25  ;;  %1789 = vmatmul.mubr.msk.f32.gmra.mxu0 %vm54_vm1, %v30_v32 }
  0x3d   :  { %1899 = vmatprep.subr.mxu1 %v2439_v1  ;;  %1791 = vmatprep.mubr.msk.f32.mxu0 %vm54_vm1, %v31_v33 }
  0x3e   :  { %1900 = vmatpush3.msra.mxu1 %v2607_v26 }
  0x3f   :  { %1901 = vmatprep.subr.mxu1 %v2439_v1 }
  0x40   :  { %1902 = vmatpush3.msra.mxu1 %v2619_v28  ;;  %1792 = vmatmul.mubr.msk.f32.gmra.mxu0 %vm54_vm1, %v32_v34 }
  0x41   :  { %1903 = vmatprep.subr.mxu1 %v2439_v1  ;;  %1794 = vmatprep.mubr.msk.f32.mxu0 %vm54_vm1, %v33_v35 }
  0x42   :  { %1904 = vmatpush3.msra.mxu1 %v2631_v30 }
  0x43   :  { %1943 = vmatprep.subr.mxu1 %v2439_v1 }
  0x44   :  { %1795 = vmatmul.mubr.msk.f32.gmra.mxu0 %vm54_vm1, %v34_v36 }
  0x45   :  { %1797 = vmatprep.mubr.msk.f32.mxu0 %vm54_vm1, %v35_v37 }
  0x48   :  { %1798 = vmatmul.mubr.msk.f32.gmra.mxu0 %vm54_vm1, %v36_v38 }
  0x49   :  { %1800 = vmatprep.mubr.msk.f32.mxu0 %vm54_vm1, %v37_v39 }
  0x4c   :  { %1801 = vmatmul.mubr.msk.f32.gmra.mxu0 %vm54_vm1, %v38_v40 }
  0x4d   :  { %1870 = vmatprep.mubr.msk.f32.mxu0 %vm2440_vm0, %v2439_v1 }
  0xd4   :  { %v1781_v41 = vpop.f32.mrf.mxu0 }
  0xd5   :  { %v175_v63 = vadd.f32 %v1781_v41, %v2745_v42 }
  0xd6   :  { %v169_v43 = vpop.f32.mrf.mxu0 }
  0xd7   :  { %v170_v44 = vadd.f32 %v2745_v42, %v169_v43 }
  0xd9   :  { %v2782_v49 = vpop.f32.mrf.mxu0 }
  0xda   :  { %v185_v19 = vadd.f32 %v2782_v49, %v2745_v42 }
  0xdb   :  { %v179_v50 = vpop.f32.mrf.mxu0 }
  0xdc   :  { %v180_v10 = vadd.f32 %v2745_v42, %v179_v50 }
  0xdf   :  { %v2784_v51 = vpop.f32.mrf.mxu0 }
  0xe0   :  { %v195_v36 = vadd.f32 %v2784_v51, %v2745_v42 }
  0xe1   :  { %v2786_v52 = vpop.f32.mrf.mxu0 }
  0xe2   :  { %v331_v45 = vpop.f32.mrf.mxu1  ;;  %v190_v31 = vadd.f32 %v2745_v42, %v2786_v52  ;;  %v3072_v52 = vld [vmem:[%s3327_s2 + $0x70] sm:$0xff] }
  0xe3   :  { %v335_v46 = vadd.f32 %v331_v45, %v170_v44 }
  0xe4   :  { %v1837_v47 = vpop.f32.mrf.mxu1 }
  0xe5   :  { %2368 = vtanh.f32 %v335_v46 }
  0xf2   :  { %v2369_v48 = vpop.eup %2368 }
  0xf3   :  { %337 = vst [vmem:[#allocation3] sm:$0xff] %v2369_v48  ;;  %1871 = vmatmul.mubr.f32.vlgmr.msra.gmra.mxu0 %v2369_v48 }
  0xf4   :  { %1909 = vmatpush3.msra.mxu0 %v2472_v0  ;;  %1940 = vmatprep.mubr.msk.f32.mxu0 %vm2440_vm0, %v2439_v1 }
  0xf5   :  { %1910 = vmatprep.subr.mxu0 %v2439_v1 }
  0xf6   :  { %1911 = vmatpush3.msra.mxu0 %v2478_v2 }
  0xf7   :  { %1912 = vmatprep.subr.mxu0 %v2439_v1 }
  0xf8   :  { %1913 = vmatpush3.msra.mxu0 %v2493_v5 }
  0xf9   :  { %1914 = vmatprep.subr.mxu0 %v2439_v1 }
  0xfa   :  { %1915 = vmatpush3.msra.mxu0 %v2503_v7 }
  0xfb   :  { %1916 = vmatprep.subr.mxu0 %v2439_v1 }
  0xfc   :  { %1917 = vmatpush3.msra.mxu0 %v2513_v9  ;;  %v2788_v53 = vpop.f32.mrf.mxu0 }
  0xfd   :  { %1918 = vmatprep.subr.mxu0 %v2439_v1  ;;  %v205_v47 = vadd.f32 %v2788_v53, %v2745_v42  ;;  %v3079_v53 = vld [vmem:[%s3327_s2 + $0x68] sm:$0xff] }
  0xfe   :  { %1919 = vmatpush3.msra.mxu0 %v2523_v11  ;;  %v2790_v54 = vpop.f32.mrf.mxu0 }
  0xff   :  { %1920 = vmatprep.subr.mxu0 %v2439_v1  ;;  %v200_v41 = vadd.f32 %v2745_v42, %v2790_v54  ;;  %v3086_v54 = vld [vmem:[%s3327_s2 + $0x60] sm:$0xff] }
 0x100   :  { %1921 = vmatpush3.msra.mxu0 %v2533_v13  ;;  %v2792_v55 = vpop.f32.mrf.mxu0 }
 0x101   :  { %1922 = vmatprep.subr.mxu0 %v2439_v1 }
 0x102   :  { %1923 = vmatpush3.msra.mxu0 %v2543_v15  ;;  %v2794_v56 = vpop.f32.mrf.mxu0 }
 0x103   :  { %1924 = vmatprep.subr.mxu0 %v2439_v1 }
 0x104   :  { %1925 = vmatpush3.msra.mxu0 %v2553_v17  ;;  %v2796_v57 = vpop.f32.mrf.mxu0 }
 0x105   :  { %1926 = vmatprep.subr.mxu0 %v2439_v1 }
 0x106   :  { %1927 = vmatpush3.msra.mxu0 %v2566_v20  ;;  %v2798_v58 = vpop.f32.mrf.mxu0 }
 0x107   :  { %1928 = vmatprep.subr.mxu0 %v2439_v1 }
 0x108   :  { %1929 = vmatpush3.msra.mxu0 %v2574_v21  ;;  %v2800_v59 = vpop.f32.mrf.mxu0 }
 0x109   :  { %1930 = vmatprep.subr.mxu0 %v2439_v1 }
 0x10a   :  { %1931 = vmatpush3.msra.mxu0 %v2586_v23  ;;  %v2802_v60 = vpop.f32.mrf.mxu0 }
 0x10b   :  { %1932 = vmatprep.subr.mxu0 %v2439_v1 }
 0x10c   :  { %1933 = vmatpush3.msra.mxu0 %v2598_v25  ;;  %v2804_v61 = vpop.f32.mrf.mxu0 }
 0x10d   :  { %1934 = vmatprep.subr.mxu0 %v2439_v1 }
 0x10e   :  { %1935 = vmatpush3.msra.mxu0 %v2607_v26  ;;  %v2806_v62 = vpop.f32.mrf.mxu0 }
 0x10f   :  { %1936 = vmatprep.subr.mxu0 %v2439_v1 }
 0x110   :  { %1937 = vmatpush3.msra.mxu0 %v2619_v28 }
 0x111   :  { %1938 = vmatprep.subr.mxu0 %v2439_v1 }
 0x112   :  { %1939 = vmatpush3.msra.mxu0 %v2631_v30 }
 0x113   :  { %1978 = vmatprep.subr.mxu0 %v2439_v1 }
 0x1b3   :  { %v404_v3 = vpop.f32.mrf.mxu0 }
 0x1b4   :  { %v408_v4 = vadd.f32 %v404_v3, %v175_v63  ;;  %v3100_v63 = vld [vmem:[%s3327_s2 + $0x50] sm:$0xff]  ;;  %v3185_v3 = vld [vmem:[%s3327_s2 + $0x18] sm:$0xff] }
 0x1b5   :  { %v1872_v6 = vpop.f32.mrf.mxu0 }
 0x1b6   :  { %2370 = vtanh.f32 %v408_v4  ;;  %v3192_v4 = vld [vmem:[%s3327_s2 + $0x10] sm:$0xff]  ;;  %v3199_v6 = vld [vmem:[%s3327_s2 + $0x8] sm:$0xff] }
 0x1c3   :  { %v2371_v8 = vpop.eup %2370 }
 0x1c4   :  { %410 = vst [vmem:[#allocation3 + $0x8] sm:$0xff] %v2371_v8  ;;  %1906 = vmatmul.mubr.f32.vlgmr.msra.gmra.mxu1 %v2371_v8  ;;  %v3206_v8 = vld [vmem:[%s3327_s2] sm:$0xff] }
 0x1c5   :  { %1944 = vmatpush3.msra.mxu1 %v2472_v0  ;;  %1975 = vmatprep.mubr.msk.f32.mxu1 %vm2440_vm0, %v2439_v1 }
 0x1c6   :  { %1945 = vmatprep.subr.mxu1 %v2439_v1 }
 0x1c7   :  { %1946 = vmatpush3.msra.mxu1 %v2478_v2 }
 0x1c8   :  { %1947 = vmatprep.subr.mxu1 %v2439_v1 }
 0x1c9   :  { %1948 = vmatpush3.msra.mxu1 %v2493_v5 }
 0x1ca   :  { %1949 = vmatprep.subr.mxu1 %v2439_v1 }
 0x1cb   :  { %1950 = vmatpush3.msra.mxu1 %v2503_v7 }
 0x1cc   :  { %1951 = vmatprep.subr.mxu1 %v2439_v1 }
 0x1cd   :  { %1952 = vmatpush3.msra.mxu1 %v2513_v9 }
 0x1ce   :  { %1953 = vmatprep.subr.mxu1 %v2439_v1 }
 0x1cf   :  { %1954 = vmatpush3.msra.mxu1 %v2523_v11 }
 0x1d0   :  { %1955 = vmatprep.subr.mxu1 %v2439_v1 }
 0x1d1   :  { %1956 = vmatpush3.msra.mxu1 %v2533_v13 }
 0x1d2   :  { %1957 = vmatprep.subr.mxu1 %v2439_v1 }
 0x1d3   :  { %1958 = vmatpush3.msra.mxu1 %v2543_v15 }
 0x1d4   :  { %1959 = vmatprep.subr.mxu1 %v2439_v1 }
 0x1d5   :  { %1960 = vmatpush3.msra.mxu1 %v2553_v17 }
 0x1d6   :  { %1961 = vmatprep.subr.mxu1 %v2439_v1 }
 0x1d7   :  { %1962 = vmatpush3.msra.mxu1 %v2566_v20 }
 0x1d8   :  { %1963 = vmatprep.subr.mxu1 %v2439_v1 }
 0x1d9   :  { %1964 = vmatpush3.msra.mxu1 %v2574_v21 }
 0x1da   :  { %1965 = vmatprep.subr.mxu1 %v2439_v1 }
 0x1db   :  { %1966 = vmatpush3.msra.mxu1 %v2586_v23 }
 0x1dc   :  { %1967 = vmatprep.subr.mxu1 %v2439_v1 }
 0x1dd   :  { %1968 = vmatpush3.msra.mxu1 %v2598_v25 }
 0x1de   :  { %1969 = vmatprep.subr.mxu1 %v2439_v1 }
 0x1df   :  { %1970 = vmatpush3.msra.mxu1 %v2607_v26 }
 0x1e0   :  { %1971 = vmatprep.subr.mxu1 %v2439_v1 }
 0x1e1   :  { %1972 = vmatpush3.msra.mxu1 %v2619_v28 }
 0x1e2   :  { %1973 = vmatprep.subr.mxu1 %v2439_v1 }
 0x1e3   :  { %1974 = vmatpush3.msra.mxu1 %v2631_v30 }
 0x1e4   :  { %2013 = vmatprep.subr.mxu1 %v2439_v1 }
 0x284   :  { %v477_v12 = vpop.f32.mrf.mxu1 }
 0x285   :  { %v481_v14 = vadd.f32 %v477_v12, %v180_v10  ;;  %v220_v10 = vadd.f32 %v2745_v42, %v2798_v58  ;;  %v225_v58 = vadd.f32 %v2796_v57, %v2745_v42  ;;  %v230_v57 = vadd.f32 %v2745_v42, %v2802_v60 }
 0x286   :  { %v1907_v16 = vpop.f32.mrf.mxu1 }
 0x287   :  { %2372 = vtanh.f32 %v481_v14 }
 0x294   :  { %v2373_v18 = vpop.eup %2372 }
 0x295   :  { %483 = vst [vmem:[#allocation3 + $0x10] sm:$0xff] %v2373_v18  ;;  %1941 = vmatmul.mubr.f32.vlgmr.msra.gmra.mxu0 %v2373_v18 }
 0x296   :  { %1979 = vmatpush3.msra.mxu0 %v2472_v0  ;;  %2010 = vmatprep.mubr.msk.f32.mxu0 %vm2440_vm0, %v2439_v1 }
 0x297   :  { %1980 = vmatprep.subr.mxu0 %v2439_v1 }
 0x298   :  { %1981 = vmatpush3.msra.mxu0 %v2478_v2 }
 0x299   :  { %1982 = vmatprep.subr.mxu0 %v2439_v1 }
 0x29a   :  { %1983 = vmatpush3.msra.mxu0 %v2493_v5 }
 0x29b   :  { %1984 = vmatprep.subr.mxu0 %v2439_v1 }
 0x29c   :  { %1985 = vmatpush3.msra.mxu0 %v2503_v7 }
 0x29d   :  { %1986 = vmatprep.subr.mxu0 %v2439_v1 }
 0x29e   :  { %1987 = vmatpush3.msra.mxu0 %v2513_v9 }
 0x29f   :  { %1988 = vmatprep.subr.mxu0 %v2439_v1 }
 0x2a0   :  { %1989 = vmatpush3.msra.mxu0 %v2523_v11 }
 0x2a1   :  { %1990 = vmatprep.subr.mxu0 %v2439_v1 }
 0x2a2   :  { %1991 = vmatpush3.msra.mxu0 %v2533_v13 }
 0x2a3   :  { %1992 = vmatprep.subr.mxu0 %v2439_v1 }
 0x2a4   :  { %1993 = vmatpush3.msra.mxu0 %v2543_v15 }
 0x2a5   :  { %1994 = vmatprep.subr.mxu0 %v2439_v1 }
 0x2a6   :  { %1995 = vmatpush3.msra.mxu0 %v2553_v17 }
 0x2a7   :  { %1996 = vmatprep.subr.mxu0 %v2439_v1 }
 0x2a8   :  { %1997 = vmatpush3.msra.mxu0 %v2566_v20 }
 0x2a9   :  { %1998 = vmatprep.subr.mxu0 %v2439_v1 }
 0x2aa   :  { %1999 = vmatpush3.msra.mxu0 %v2574_v21 }
 0x2ab   :  { %2000 = vmatprep.subr.mxu0 %v2439_v1 }
 0x2ac   :  { %2001 = vmatpush3.msra.mxu0 %v2586_v23 }
 0x2ad   :  { %2002 = vmatprep.subr.mxu0 %v2439_v1 }
 0x2ae   :  { %2003 = vmatpush3.msra.mxu0 %v2598_v25 }
 0x2af   :  { %2004 = vmatprep.subr.mxu0 %v2439_v1 }
 0x2b0   :  { %2005 = vmatpush3.msra.mxu0 %v2607_v26 }
 0x2b1   :  { %2006 = vmatprep.subr.mxu0 %v2439_v1 }
 0x2b2   :  { %2007 = vmatpush3.msra.mxu0 %v2619_v28 }
 0x2b3   :  { %2008 = vmatprep.subr.mxu0 %v2439_v1 }
 0x2b4   :  { %2009 = vmatpush3.msra.mxu0 %v2631_v30 }
 0x2b5   :  { %2048 = vmatprep.subr.mxu0 %v2439_v1 }
 0x355   :  { %v550_v22 = vpop.f32.mrf.mxu0 }
 0x356   :  { %v554_v24 = vadd.f32 %v550_v22, %v185_v19 }
 0x357   :  { %v1942_v27 = vpop.f32.mrf.mxu0 }
 0x358   :  { %2374 = vtanh.f32 %v554_v24 }
 0x365   :  { %v2375_v29 = vpop.eup %2374 }
 0x366   :  { %556 = vst [vmem:[#allocation3 + $0x18] sm:$0xff] %v2375_v29  ;;  %1976 = vmatmul.mubr.f32.vlgmr.msra.gmra.mxu1 %v2375_v29 }
 0x367   :  { %2014 = vmatpush3.msra.mxu1 %v2472_v0  ;;  %2045 = vmatprep.mubr.msk.f32.mxu1 %vm2440_vm0, %v2439_v1 }
 0x368   :  { %2015 = vmatprep.subr.mxu1 %v2439_v1 }
 0x369   :  { %2016 = vmatpush3.msra.mxu1 %v2478_v2 }
 0x36a   :  { %2017 = vmatprep.subr.mxu1 %v2439_v1 }
 0x36b   :  { %2018 = vmatpush3.msra.mxu1 %v2493_v5 }
 0x36c   :  { %2019 = vmatprep.subr.mxu1 %v2439_v1 }
 0x36d   :  { %2020 = vmatpush3.msra.mxu1 %v2503_v7 }
 0x36e   :  { %2021 = vmatprep.subr.mxu1 %v2439_v1 }
 0x36f   :  { %2022 = vmatpush3.msra.mxu1 %v2513_v9 }
 0x370   :  { %2023 = vmatprep.subr.mxu1 %v2439_v1 }
 0x371   :  { %2024 = vmatpush3.msra.mxu1 %v2523_v11 }
 0x372   :  { %2025 = vmatprep.subr.mxu1 %v2439_v1 }
 0x373   :  { %2026 = vmatpush3.msra.mxu1 %v2533_v13 }
 0x374   :  { %2027 = vmatprep.subr.mxu1 %v2439_v1 }
 0x375   :  { %2028 = vmatpush3.msra.mxu1 %v2543_v15 }
 0x376   :  { %2029 = vmatprep.subr.mxu1 %v2439_v1 }
 0x377   :  { %2030 = vmatpush3.msra.mxu1 %v2553_v17 }
 0x378   :  { %2031 = vmatprep.subr.mxu1 %v2439_v1 }
 0x379   :  { %2032 = vmatpush3.msra.mxu1 %v2566_v20 }
 0x37a   :  { %2033 = vmatprep.subr.mxu1 %v2439_v1 }
 0x37b   :  { %2034 = vmatpush3.msra.mxu1 %v2574_v21 }
 0x37c   :  { %2035 = vmatprep.subr.mxu1 %v2439_v1 }
 0x37d   :  { %2036 = vmatpush3.msra.mxu1 %v2586_v23 }
 0x37e   :  { %2037 = vmatprep.subr.mxu1 %v2439_v1 }
 0x37f   :  { %2038 = vmatpush3.msra.mxu1 %v2598_v25 }
 0x380   :  { %2039 = vmatprep.subr.mxu1 %v2439_v1 }
 0x381   :  { %2040 = vmatpush3.msra.mxu1 %v2607_v26 }
 0x382   :  { %2041 = vmatprep.subr.mxu1 %v2439_v1 }
 0x383   :  { %2042 = vmatpush3.msra.mxu1 %v2619_v28 }
 0x384   :  { %2043 = vmatprep.subr.mxu1 %v2439_v1 }
 0x385   :  { %2044 = vmatpush3.msra.mxu1 %v2631_v30 }
 0x386   :  { %2083 = vmatprep.subr.mxu1 %v2439_v1 }
 0x426   :  { %v623_v32 = vpop.f32.mrf.mxu1 }
 0x427   :  { %v627_v33 = vadd.f32 %v623_v32, %v190_v31 }
 0x428   :  { %v1977_v34 = vpop.f32.mrf.mxu1 }
 0x429   :  { %2376 = vtanh.f32 %v627_v33 }
 0x436   :  { %v2377_v35 = vpop.eup %2376 }
 0x437   :  { %629 = vst [vmem:[#allocation3 + $0x20] sm:$0xff] %v2377_v35  ;;  %2011 = vmatmul.mubr.f32.vlgmr.msra.gmra.mxu0 %v2377_v35 }
 0x438   :  { %2049 = vmatpush3.msra.mxu0 %v2472_v0  ;;  %2080 = vmatprep.mubr.msk.f32.mxu0 %vm2440_vm0, %v2439_v1 }
 0x439   :  { %2050 = vmatprep.subr.mxu0 %v2439_v1 }
 0x43a   :  { %2051 = vmatpush3.msra.mxu0 %v2478_v2 }
 0x43b   :  { %2052 = vmatprep.subr.mxu0 %v2439_v1 }
 0x43c   :  { %2053 = vmatpush3.msra.mxu0 %v2493_v5 }
 0x43d   :  { %2054 = vmatprep.subr.mxu0 %v2439_v1 }
 0x43e   :  { %2055 = vmatpush3.msra.mxu0 %v2503_v7 }
 0x43f   :  { %2056 = vmatprep.subr.mxu0 %v2439_v1 }
 0x440   :  { %2057 = vmatpush3.msra.mxu0 %v2513_v9 }
 0x441   :  { %2058 = vmatprep.subr.mxu0 %v2439_v1 }
 0x442   :  { %2059 = vmatpush3.msra.mxu0 %v2523_v11 }
 0x443   :  { %2060 = vmatprep.subr.mxu0 %v2439_v1 }
 0x444   :  { %2061 = vmatpush3.msra.mxu0 %v2533_v13 }
 0x445   :  { %2062 = vmatprep.subr.mxu0 %v2439_v1 }
 0x446   :  { %2063 = vmatpush3.msra.mxu0 %v2543_v15 }
 0x447   :  { %2064 = vmatprep.subr.mxu0 %v2439_v1 }
 0x448   :  { %2065 = vmatpush3.msra.mxu0 %v2553_v17 }
 0x449   :  { %2066 = vmatprep.subr.mxu0 %v2439_v1 }
 0x44a   :  { %2067 = vmatpush3.msra.mxu0 %v2566_v20 }
 0x44b   :  { %2068 = vmatprep.subr.mxu0 %v2439_v1 }
 0x44c   :  { %2069 = vmatpush3.msra.mxu0 %v2574_v21 }
 0x44d   :  { %2070 = vmatprep.subr.mxu0 %v2439_v1 }
 0x44e   :  { %2071 = vmatpush3.msra.mxu0 %v2586_v23 }
 0x44f   :  { %2072 = vmatprep.subr.mxu0 %v2439_v1 }
 0x450   :  { %2073 = vmatpush3.msra.mxu0 %v2598_v25 }
 0x451   :  { %2074 = vmatprep.subr.mxu0 %v2439_v1 }
 0x452   :  { %2075 = vmatpush3.msra.mxu0 %v2607_v26 }
 0x453   :  { %2076 = vmatprep.subr.mxu0 %v2439_v1 }
 0x454   :  { %2077 = vmatpush3.msra.mxu0 %v2619_v28 }
 0x455   :  { %2078 = vmatprep.subr.mxu0 %v2439_v1 }
 0x456   :  { %2079 = vmatpush3.msra.mxu0 %v2631_v30 }
 0x457   :  { %2118 = vmatprep.subr.mxu0 %v2439_v1 }
 0x4f7   :  { %v696_v37 = vpop.f32.mrf.mxu0 }
 0x4f8   :  { %v700_v38 = vadd.f32 %v696_v37, %v195_v36 }
 0x4f9   :  { %v2012_v39 = vpop.f32.mrf.mxu0 }
 0x4fa   :  { %2378 = vtanh.f32 %v700_v38 }
 0x507   :  { %v2379_v40 = vpop.eup %2378 }
 0x508   :  { %702 = vst [vmem:[#allocation3 + $0x28] sm:$0xff] %v2379_v40  ;;  %2046 = vmatmul.mubr.f32.vlgmr.msra.gmra.mxu1 %v2379_v40 }
 0x509   :  { %2084 = vmatpush3.msra.mxu1 %v2472_v0  ;;  %2115 = vmatprep.mubr.msk.f32.mxu1 %vm2440_vm0, %v2439_v1 }
 0x50a   :  { %2085 = vmatprep.subr.mxu1 %v2439_v1 }
 0x50b   :  { %2086 = vmatpush3.msra.mxu1 %v2478_v2 }
 0x50c   :  { %2087 = vmatprep.subr.mxu1 %v2439_v1 }
 0x50d   :  { %2088 = vmatpush3.msra.mxu1 %v2493_v5 }
 0x50e   :  { %2089 = vmatprep.subr.mxu1 %v2439_v1 }
 0x50f   :  { %2090 = vmatpush3.msra.mxu1 %v2503_v7 }
 0x510   :  { %2091 = vmatprep.subr.mxu1 %v2439_v1 }
 0x511   :  { %2092 = vmatpush3.msra.mxu1 %v2513_v9 }
 0x512   :  { %2093 = vmatprep.subr.mxu1 %v2439_v1 }
 0x513   :  { %2094 = vmatpush3.msra.mxu1 %v2523_v11 }
 0x514   :  { %2095 = vmatprep.subr.mxu1 %v2439_v1 }
 0x515   :  { %2096 = vmatpush3.msra.mxu1 %v2533_v13 }
 0x516   :  { %2097 = vmatprep.subr.mxu1 %v2439_v1 }
 0x517   :  { %2098 = vmatpush3.msra.mxu1 %v2543_v15 }
 0x518   :  { %2099 = vmatprep.subr.mxu1 %v2439_v1 }
 0x519   :  { %2100 = vmatpush3.msra.mxu1 %v2553_v17 }
 0x51a   :  { %2101 = vmatprep.subr.mxu1 %v2439_v1 }
 0x51b   :  { %2102 = vmatpush3.msra.mxu1 %v2566_v20 }
 0x51c   :  { %2103 = vmatprep.subr.mxu1 %v2439_v1 }
 0x51d   :  { %2104 = vmatpush3.msra.mxu1 %v2574_v21 }
 0x51e   :  { %2105 = vmatprep.subr.mxu1 %v2439_v1 }
 0x51f   :  { %2106 = vmatpush3.msra.mxu1 %v2586_v23 }
 0x520   :  { %2107 = vmatprep.subr.mxu1 %v2439_v1 }
 0x521   :  { %2108 = vmatpush3.msra.mxu1 %v2598_v25 }
 0x522   :  { %2109 = vmatprep.subr.mxu1 %v2439_v1 }
 0x523   :  { %2110 = vmatpush3.msra.mxu1 %v2607_v26 }
 0x524   :  { %2111 = vmatprep.subr.mxu1 %v2439_v1 }
 0x525   :  { %2112 = vmatpush3.msra.mxu1 %v2619_v28 }
 0x526   :  { %2113 = vmatprep.subr.mxu1 %v2439_v1 }
 0x527   :  { %2114 = vmatpush3.msra.mxu1 %v2631_v30 }
 0x528   :  { %2153 = vmatprep.subr.mxu1 %v2439_v1 }
 0x5c8   :  { %v769_v43 = vpop.f32.mrf.mxu1 }
 0x5c9   :  { %v773_v44 = vadd.f32 %v769_v43, %v200_v41 }
 0x5ca   :  { %v2047_v45 = vpop.f32.mrf.mxu1 }
 0x5cb   :  { %2380 = vtanh.f32 %v773_v44 }
 0x5d8   :  { %v2381_v46 = vpop.eup %2380 }
 0x5d9   :  { %775 = vst [vmem:[#allocation3 + $0x30] sm:$0xff] %v2381_v46  ;;  %2081 = vmatmul.mubr.f32.vlgmr.msra.gmra.mxu0 %v2381_v46 }
 0x5da   :  { %2119 = vmatpush3.msra.mxu0 %v2472_v0  ;;  %2150 = vmatprep.mubr.msk.f32.mxu0 %vm2440_vm0, %v2439_v1 }
 0x5db   :  { %2120 = vmatprep.subr.mxu0 %v2439_v1 }
 0x5dc   :  { %2121 = vmatpush3.msra.mxu0 %v2478_v2 }
 0x5dd   :  { %2122 = vmatprep.subr.mxu0 %v2439_v1 }
 0x5de   :  { %2123 = vmatpush3.msra.mxu0 %v2493_v5 }
 0x5df   :  { %2124 = vmatprep.subr.mxu0 %v2439_v1 }
 0x5e0   :  { %2125 = vmatpush3.msra.mxu0 %v2503_v7 }
 0x5e1   :  { %2126 = vmatprep.subr.mxu0 %v2439_v1 }
 0x5e2   :  { %2127 = vmatpush3.msra.mxu0 %v2513_v9 }
 0x5e3   :  { %2128 = vmatprep.subr.mxu0 %v2439_v1 }
 0x5e4   :  { %2129 = vmatpush3.msra.mxu0 %v2523_v11 }
 0x5e5   :  { %2130 = vmatprep.subr.mxu0 %v2439_v1 }
 0x5e6   :  { %2131 = vmatpush3.msra.mxu0 %v2533_v13 }
 0x5e7   :  { %2132 = vmatprep.subr.mxu0 %v2439_v1 }
 0x5e8   :  { %2133 = vmatpush3.msra.mxu0 %v2543_v15 }
 0x5e9   :  { %2134 = vmatprep.subr.mxu0 %v2439_v1 }
 0x5ea   :  { %2135 = vmatpush3.msra.mxu0 %v2553_v17 }
 0x5eb   :  { %2136 = vmatprep.subr.mxu0 %v2439_v1 }
 0x5ec   :  { %2137 = vmatpush3.msra.mxu0 %v2566_v20 }
 0x5ed   :  { %2138 = vmatprep.subr.mxu0 %v2439_v1 }
 0x5ee   :  { %2139 = vmatpush3.msra.mxu0 %v2574_v21 }
 0x5ef   :  { %2140 = vmatprep.subr.mxu0 %v2439_v1 }
 0x5f0   :  { %2141 = vmatpush3.msra.mxu0 %v2586_v23 }
 0x5f1   :  { %2142 = vmatprep.subr.mxu0 %v2439_v1 }
 0x5f2   :  { %2143 = vmatpush3.msra.mxu0 %v2598_v25 }
 0x5f3   :  { %2144 = vmatprep.subr.mxu0 %v2439_v1 }
 0x5f4   :  { %2145 = vmatpush3.msra.mxu0 %v2607_v26 }
 0x5f5   :  { %2146 = vmatprep.subr.mxu0 %v2439_v1 }
 0x5f6   :  { %2147 = vmatpush3.msra.mxu0 %v2619_v28 }
 0x5f7   :  { %2148 = vmatprep.subr.mxu0 %v2439_v1 }
 0x5f8   :  { %2149 = vmatpush3.msra.mxu0 %v2631_v30 }
 0x5f9   :  { %2188 = vmatprep.subr.mxu0 %v2439_v1 }
 0x699   :  { %v842_v48 = vpop.f32.mrf.mxu0 }
 0x69a   :  { %v846_v49 = vadd.f32 %v842_v48, %v205_v47 }
 0x69b   :  { %v2082_v50 = vpop.f32.mrf.mxu0 }
 0x69c   :  { %2382 = vtanh.f32 %v846_v49 }
 0x6a9   :  { %v2383_v51 = vpop.eup %2382 }
 0x6aa   :  { %848 = vst [vmem:[#allocation3 + $0x38] sm:$0xff] %v2383_v51  ;;  %2116 = vmatmul.mubr.f32.vlgmr.msra.gmra.mxu1 %v2383_v51 }
 0x6ab   :  { %2154 = vmatpush3.msra.mxu1 %v2472_v0  ;;  %2185 = vmatprep.mubr.msk.f32.mxu1 %vm2440_vm0, %v2439_v1  ;;  %v210_v0 = vadd.f32 %v2745_v42, %v2794_v56  ;;  %v3093_v56 = vld [vmem:[%s3327_s2 + $0x58] sm:$0xff] }
 0x6ac   :  { %2155 = vmatprep.subr.mxu1 %v2439_v1 }
 0x6ad   :  { %2156 = vmatpush3.msra.mxu1 %v2478_v2 }
 0x6ae   :  { %2157 = vmatprep.subr.mxu1 %v2439_v1 }
 0x6af   :  { %2158 = vmatpush3.msra.mxu1 %v2493_v5 }
 0x6b0   :  { %2159 = vmatprep.subr.mxu1 %v2439_v1 }
 0x6b1   :  { %2160 = vmatpush3.msra.mxu1 %v2503_v7 }
 0x6b2   :  { %2161 = vmatprep.subr.mxu1 %v2439_v1 }
 0x6b3   :  { %2162 = vmatpush3.msra.mxu1 %v2513_v9 }
 0x6b4   :  { %2163 = vmatprep.subr.mxu1 %v2439_v1 }
 0x6b5   :  { %2164 = vmatpush3.msra.mxu1 %v2523_v11  ;;  %v3063_v11 = vld [vmem:[%s3327_s2 + $0x78] sm:$0xff] }
 0x6b6   :  { %2165 = vmatprep.subr.mxu1 %v2439_v1 }
 0x6b7   :  { %2166 = vmatpush3.msra.mxu1 %v2533_v13 }
 0x6b8   :  { %2167 = vmatprep.subr.mxu1 %v2439_v1 }
 0x6b9   :  { %2168 = vmatpush3.msra.mxu1 %v2543_v15 }
 0x6ba   :  { %2169 = vmatprep.subr.mxu1 %v2439_v1 }
 0x6bb   :  { %2170 = vmatpush3.msra.mxu1 %v2553_v17 }
 0x6bc   :  { %2171 = vmatprep.subr.mxu1 %v2439_v1 }
 0x6bd   :  { %2172 = vmatpush3.msra.mxu1 %v2566_v20 }
 0x6be   :  { %2173 = vmatprep.subr.mxu1 %v2439_v1 }
 0x6bf   :  { %2174 = vmatpush3.msra.mxu1 %v2574_v21 }
 0x6c0   :  { %2175 = vmatprep.subr.mxu1 %v2439_v1 }
 0x6c1   :  { %2176 = vmatpush3.msra.mxu1 %v2586_v23 }
 0x6c2   :  { %2177 = vmatprep.subr.mxu1 %v2439_v1 }
 0x6c3   :  { %2178 = vmatpush3.msra.mxu1 %v2598_v25 }
 0x6c4   :  { %2179 = vmatprep.subr.mxu1 %v2439_v1 }
 0x6c5   :  { %2180 = vmatpush3.msra.mxu1 %v2607_v26 }
 0x6c6   :  { %2181 = vmatprep.subr.mxu1 %v2439_v1 }
 0x6c7   :  { %2182 = vmatpush3.msra.mxu1 %v2619_v28 }
 0x6c8   :  { %2183 = vmatprep.subr.mxu1 %v2439_v1 }
 0x6c9   :  { %2184 = vmatpush3.msra.mxu1 %v2631_v30 }
 0x6ca   :  { %2223 = vmatprep.subr.mxu1 %v2439_v1 }
 0x76a   :  { %v915_v2 = vpop.f32.mrf.mxu1 }
 0x76b   :  { %v919_v5 = vadd.f32 %v915_v2, %v210_v0 }
 0x76c   :  { %v2117_v7 = vpop.f32.mrf.mxu1 }
 0x76d   :  { %2384 = vtanh.f32 %v919_v5 }
 0x77a   :  { %v2385_v9 = vpop.eup %2384 }
 0x77b   :  { %921 = vst [vmem:[#allocation3 + $0x40] sm:$0xff] %v2385_v9  ;;  %2151 = vmatmul.mubr.f32.vlgmr.msra.gmra.mxu0 %v2385_v9 }
 0x77c   :  { %2189 = vmatpush3.msra.mxu0 %v3063_v11  ;;  %2220 = vmatprep.mubr.msk.f32.mxu0 %vm2440_vm0, %v2439_v1 }
 0x77d   :  { %2190 = vmatprep.subr.mxu0 %v2439_v1 }
 0x77e   :  { %2191 = vmatpush3.msra.mxu0 %v3072_v52 }
 0x77f   :  { %2192 = vmatprep.subr.mxu0 %v2439_v1 }
 0x780   :  { %2193 = vmatpush3.msra.mxu0 %v3079_v53 }
 0x781   :  { %2194 = vmatprep.subr.mxu0 %v2439_v1 }
 0x782   :  { %2195 = vmatpush3.msra.mxu0 %v3086_v54 }
 0x783   :  { %2196 = vmatprep.subr.mxu0 %v2439_v1 }
 0x784   :  { %2197 = vmatpush3.msra.mxu0 %v3093_v56 }
 0x785   :  { %2198 = vmatprep.subr.mxu0 %v2439_v1 }
 0x786   :  { %2199 = vmatpush3.msra.mxu0 %v3100_v63 }
 0x787   :  { %2200 = vmatprep.subr.mxu0 %v2439_v1 }
 0x788   :  { %2201 = vmatpush3.msra.mxu0 %v2533_v13  ;;  %v215_v13 = vadd.f32 %v2792_v55, %v2745_v42  ;;  %v3178_v55 = vld [vmem:[%s3327_s2 + $0x20] sm:$0xff] }
 0x789   :  { %2202 = vmatprep.subr.mxu0 %v2439_v1  ;;  %v2416_v42 = vld [vmem:[%s3328_s3] ss:$0 sm:$0xff]  ;;  %s2441_s3 = smov [#allocation3]  }
 0x78a   :  { %2203 = vmatpush3.msra.mxu0 %v2543_v15  ;;  %v235_v60 = vadd.f32 %v2416_v42, %v2800_v59  ;;  %v240_v38 = vadd.f32 %v2416_v42, %v2806_v62  ;;  %v245_v43 = vadd.f32 %v2416_v42, %v2804_v61  ;;  %s1439_s21 = sshll.u32 %s2441_s3, 4  ;;  %s1440_s21 = int_to_ptr.vmem [resolvable:$true] %s1439_s21 }
 0x78b   :  { %2204 = vmatprep.subr.mxu0 %v2439_v1  ;;  %s2417_s22 = scalar_lea.vmem %s1440_s21, 2048  ;;  %p2422_p1 = scmp.lt.s32.totalorder %s1440_s21, %s1440_s21 }
 0x78c   :  { %2205 = vmatpush3.msra.mxu0 %v2553_v17  ;;  %p2418_p0 = scmp.ne.s32.totalorder %s1440_s21, %s2417_s22  ;;  %p2423_p2 = scmp.lt.s32.totalorder %s2417_s22, %s2417_s22 }
 0x78d   :  { %2206 = vmatprep.subr.mxu0 %v2439_v1 }
 0x78e   :  { %2207 = vmatpush3.msra.mxu0 %v2566_v20  ;;  %p2424_p3 = por %p2423_p2, %p2422_p1 }
 0x78f   :  { %2208 = vmatprep.subr.mxu0 %v2439_v1 }
 0x790   :  { %2209 = vmatpush3.msra.mxu0 %v2574_v21  ;;  %p2425_p4 = pnand %p2424_p3, %p2418_p0 }
 0x791   :  { %2210 = vmatprep.subr.mxu0 %v2439_v1 }
 0x792   :  { %2211 = vmatpush3.msra.mxu0 %v2586_v23  ;;  %v3143_v23 = vld [vmem:[%s3327_s2 + $0x48] sm:$0xff] }
 0x793   :  { %2212 = vmatprep.subr.mxu0 %v2439_v1 }
 0x794   :  { %2213 = vmatpush3.msra.mxu0 %v2598_v25  ;;  %v3150_v25 = vld [vmem:[%s3327_s2 + $0x40] sm:$0xff] }
 0x795   :  { %2214 = vmatprep.subr.mxu0 %v2439_v1 }
 0x796   :  { %2215 = vmatpush3.msra.mxu0 %v2607_v26  ;;  %v3157_v26 = vld [vmem:[%s3327_s2 + $0x38] sm:$0xff] }
 0x797   :  { %2216 = vmatprep.subr.mxu0 %v2439_v1 }
 0x798   :  { %2217 = vmatpush3.msra.mxu0 %v2619_v28  ;;  %v3164_v28 = vld [vmem:[%s3327_s2 + $0x30] sm:$0xff] }
 0x799   :  { %2218 = vmatprep.subr.mxu0 %v2439_v1 }
 0x79a   :  { %2219 = vmatpush3.msra.mxu0 %v2631_v30  ;;  %v3171_v30 = vld [vmem:[%s3327_s2 + $0x28] sm:$0xff] }
 0x79b   :  { %2258 = vmatprep.subr.mxu0 %v2439_v1 }
 0x83b   :  { %v988_v15 = vpop.f32.mrf.mxu0 }
 0x83c   :  { %v992_v17 = vadd.f32 %v988_v15, %v215_v13 }
 0x83d   :  { %v2152_v20 = vpop.f32.mrf.mxu0 }
 0x83e   :  { %2386 = vtanh.f32 %v992_v17 }
 0x84b   :  { %v2387_v21 = vpop.eup %2386 }
 0x84c   :  { %994 = vst [vmem:[#allocation3 + $0x48] sm:$0xff] %v2387_v21  ;;  %2186 = vmatmul.mubr.f32.vlgmr.msra.gmra.mxu1 %v2387_v21 }
 0x84d   :  { %2224 = vmatpush3.msra.mxu1 %v3063_v11  ;;  %2255 = vmatprep.mubr.msk.f32.mxu1 %vm2440_vm0, %v2439_v1 }
 0x84e   :  { %2225 = vmatprep.subr.mxu1 %v2439_v1 }
 0x84f   :  { %2226 = vmatpush3.msra.mxu1 %v3072_v52 }
 0x850   :  { %2227 = vmatprep.subr.mxu1 %v2439_v1 }
 0x851   :  { %2228 = vmatpush3.msra.mxu1 %v3079_v53 }
 0x852   :  { %2229 = vmatprep.subr.mxu1 %v2439_v1 }
 0x853   :  { %2230 = vmatpush3.msra.mxu1 %v3086_v54 }
 0x854   :  { %2231 = vmatprep.subr.mxu1 %v2439_v1 }
 0x855   :  { %2232 = vmatpush3.msra.mxu1 %v3093_v56 }
 0x856   :  { %2233 = vmatprep.subr.mxu1 %v2439_v1 }
 0x857   :  { %2234 = vmatpush3.msra.mxu1 %v3100_v63 }
 0x858   :  { %2235 = vmatprep.subr.mxu1 %v2439_v1 }
 0x859   :  { %2236 = vmatpush3.msra.mxu1 %v3143_v23 }
 0x85a   :  { %2237 = vmatprep.subr.mxu1 %v2439_v1 }
 0x85b   :  { %2238 = vmatpush3.msra.mxu1 %v3150_v25 }
 0x85c   :  { %2239 = vmatprep.subr.mxu1 %v2439_v1 }
 0x85d   :  { %2240 = vmatpush3.msra.mxu1 %v3157_v26 }
 0x85e   :  { %2241 = vmatprep.subr.mxu1 %v2439_v1 }
 0x85f   :  { %2242 = vmatpush3.msra.mxu1 %v3164_v28 }
 0x860   :  { %2243 = vmatprep.subr.mxu1 %v2439_v1 }
 0x861   :  { %2244 = vmatpush3.msra.mxu1 %v3171_v30 }
 0x862   :  { %2245 = vmatprep.subr.mxu1 %v2439_v1 }
 0x863   :  { %2246 = vmatpush3.msra.mxu1 %v3178_v55 }
 0x864   :  { %2247 = vmatprep.subr.mxu1 %v2439_v1 }
 0x865   :  { %2248 = vmatpush3.msra.mxu1 %v3185_v3 }
 0x866   :  { %2249 = vmatprep.subr.mxu1 %v2439_v1 }
 0x867   :  { %2250 = vmatpush3.msra.mxu1 %v3192_v4 }
 0x868   :  { %2251 = vmatprep.subr.mxu1 %v2439_v1 }
 0x869   :  { %2252 = vmatpush3.msra.mxu1 %v3199_v6 }
 0x86a   :  { %2253 = vmatprep.subr.mxu1 %v2439_v1 }
 0x86b   :  { %2254 = vmatpush3.msra.mxu1 %v3206_v8 }
 0x86c   :  { %2293 = vmatprep.subr.mxu1 %v2439_v1 }
 0x90c   :  { %v1061_v12 = vpop.f32.mrf.mxu1 }
 0x90d   :  { %v1065_v14 = vadd.f32 %v1061_v12, %v220_v10 }
 0x90e   :  { %v2187_v16 = vpop.f32.mrf.mxu1 }
 0x90f   :  { %2388 = vtanh.f32 %v1065_v14 }
 0x91c   :  { %v2389_v18 = vpop.eup %2388 }
 0x91d   :  { %1067 = vst [vmem:[#allocation3 + $0x50] sm:$0xff] %v2389_v18  ;;  %2221 = vmatmul.mubr.f32.vlgmr.msra.gmra.mxu0 %v2389_v18 }
 0x91e   :  { %2259 = vmatpush3.msra.mxu0 %v3063_v11  ;;  %2290 = vmatprep.mubr.msk.f32.mxu0 %vm2440_vm0, %v2439_v1 }
 0x91f   :  { %2260 = vmatprep.subr.mxu0 %v2439_v1 }
 0x920   :  { %2261 = vmatpush3.msra.mxu0 %v3072_v52 }
 0x921   :  { %2262 = vmatprep.subr.mxu0 %v2439_v1 }
 0x922   :  { %2263 = vmatpush3.msra.mxu0 %v3079_v53 }
 0x923   :  { %2264 = vmatprep.subr.mxu0 %v2439_v1 }
 0x924   :  { %2265 = vmatpush3.msra.mxu0 %v3086_v54 }
 0x925   :  { %2266 = vmatprep.subr.mxu0 %v2439_v1 }
 0x926   :  { %2267 = vmatpush3.msra.mxu0 %v3093_v56 }
 0x927   :  { %2268 = vmatprep.subr.mxu0 %v2439_v1 }
 0x928   :  { %2269 = vmatpush3.msra.mxu0 %v3100_v63 }
 0x929   :  { %2270 = vmatprep.subr.mxu0 %v2439_v1 }
 0x92a   :  { %2271 = vmatpush3.msra.mxu0 %v3143_v23 }
 0x92b   :  { %2272 = vmatprep.subr.mxu0 %v2439_v1 }
 0x92c   :  { %2273 = vmatpush3.msra.mxu0 %v3150_v25 }
 0x92d   :  { %2274 = vmatprep.subr.mxu0 %v2439_v1 }
 0x92e   :  { %2275 = vmatpush3.msra.mxu0 %v3157_v26 }
 0x92f   :  { %2276 = vmatprep.subr.mxu0 %v2439_v1 }
 0x930   :  { %2277 = vmatpush3.msra.mxu0 %v3164_v28 }
 0x931   :  { %2278 = vmatprep.subr.mxu0 %v2439_v1 }
 0x932   :  { %2279 = vmatpush3.msra.mxu0 %v3171_v30 }
 0x933   :  { %2280 = vmatprep.subr.mxu0 %v2439_v1 }
 0x934   :  { %2281 = vmatpush3.msra.mxu0 %v3178_v55 }
 0x935   :  { %2282 = vmatprep.subr.mxu0 %v2439_v1 }
 0x936   :  { %2283 = vmatpush3.msra.mxu0 %v3185_v3 }
 0x937   :  { %2284 = vmatprep.subr.mxu0 %v2439_v1 }
 0x938   :  { %2285 = vmatpush3.msra.mxu0 %v3192_v4 }
 0x939   :  { %2286 = vmatprep.subr.mxu0 %v2439_v1 }
 0x93a   :  { %2287 = vmatpush3.msra.mxu0 %v3199_v6 }
 0x93b   :  { %2288 = vmatprep.subr.mxu0 %v2439_v1 }
 0x93c   :  { %2289 = vmatpush3.msra.mxu0 %v3206_v8 }
 0x93d   :  { %2328 = vmatprep.subr.mxu0 %v2439_v1 }
 0x9dd   :  { %v1134_v19 = vpop.f32.mrf.mxu0 }
 0x9de   :  { %v1138_v22 = vadd.f32 %v1134_v19, %v225_v58 }
 0x9df   :  { %v2222_v24 = vpop.f32.mrf.mxu0 }
 0x9e0   :  { %2390 = vtanh.f32 %v1138_v22 }
 0x9ed   :  { %v2391_v27 = vpop.eup %2390 }
 0x9ee   :  { %1140 = vst [vmem:[#allocation3 + $0x58] sm:$0xff] %v2391_v27  ;;  %2256 = vmatmul.mubr.f32.vlgmr.msra.gmra.mxu1 %v2391_v27 }
 0x9ef   :  { %2294 = vmatpush3.msra.mxu1 %v3063_v11  ;;  %2325 = vmatprep.mubr.msk.f32.mxu1 %vm2440_vm0, %v2439_v1 }
 0x9f0   :  { %2295 = vmatprep.subr.mxu1 %v2439_v1 }
 0x9f1   :  { %2296 = vmatpush3.msra.mxu1 %v3072_v52 }
 0x9f2   :  { %2297 = vmatprep.subr.mxu1 %v2439_v1 }
 0x9f3   :  { %2298 = vmatpush3.msra.mxu1 %v3079_v53 }
 0x9f4   :  { %2299 = vmatprep.subr.mxu1 %v2439_v1 }
 0x9f5   :  { %2300 = vmatpush3.msra.mxu1 %v3086_v54 }
 0x9f6   :  { %2301 = vmatprep.subr.mxu1 %v2439_v1 }
 0x9f7   :  { %2302 = vmatpush3.msra.mxu1 %v3093_v56 }
 0x9f8   :  { %2303 = vmatprep.subr.mxu1 %v2439_v1 }
 0x9f9   :  { %2304 = vmatpush3.msra.mxu1 %v3100_v63 }
 0x9fa   :  { %2305 = vmatprep.subr.mxu1 %v2439_v1 }
 0x9fb   :  { %2306 = vmatpush3.msra.mxu1 %v3143_v23 }
 0x9fc   :  { %2307 = vmatprep.subr.mxu1 %v2439_v1 }
 0x9fd   :  { %2308 = vmatpush3.msra.mxu1 %v3150_v25 }
 0x9fe   :  { %2309 = vmatprep.subr.mxu1 %v2439_v1 }
 0x9ff   :  { %2310 = vmatpush3.msra.mxu1 %v3157_v26 }
 0xa00   :  { %2311 = vmatprep.subr.mxu1 %v2439_v1 }
 0xa01   :  { %2312 = vmatpush3.msra.mxu1 %v3164_v28 }
 0xa02   :  { %2313 = vmatprep.subr.mxu1 %v2439_v1 }
 0xa03   :  { %2314 = vmatpush3.msra.mxu1 %v3171_v30 }
 0xa04   :  { %2315 = vmatprep.subr.mxu1 %v2439_v1 }
 0xa05   :  { %2316 = vmatpush3.msra.mxu1 %v3178_v55 }
 0xa06   :  { %2317 = vmatprep.subr.mxu1 %v2439_v1 }
 0xa07   :  { %2318 = vmatpush3.msra.mxu1 %v3185_v3 }
 0xa08   :  { %2319 = vmatprep.subr.mxu1 %v2439_v1 }
 0xa09   :  { %2320 = vmatpush3.msra.mxu1 %v3192_v4 }
 0xa0a   :  { %2321 = vmatprep.subr.mxu1 %v2439_v1 }
 0xa0b   :  { %2322 = vmatpush3.msra.mxu1 %v3199_v6 }
 0xa0c   :  { %2323 = vmatprep.subr.mxu1 %v2439_v1 }
 0xa0d   :  { %2324 = vmatpush3.msra.mxu1 %v3206_v8 }
 0xaae   :  { %v1207_v29 = vpop.f32.mrf.mxu1 }
 0xaaf   :  { %v1211_v31 = vadd.f32 %v1207_v29, %v230_v57 }
 0xab0   :  { %v2257_v32 = vpop.f32.mrf.mxu1 }
 0xab1   :  { %2392 = vtanh.f32 %v1211_v31 }
 0xabe   :  { %v2393_v33 = vpop.eup %2392 }
 0xabf   :  { %1213 = vst [vmem:[#allocation3 + $0x60] sm:$0xff] %v2393_v33  ;;  %2291 = vmatmul.mubr.f32.vlgmr.msra.gmra.mxu0 %v2393_v33 }
 0xac0   :  { %2329 = vmatpush3.msra.mxu0 %v3063_v11  ;;  %2360 = vmatprep.mubr.msk.f32.mxu0 %vm2440_vm0, %v2439_v1 }
 0xac1   :  { %2330 = vmatprep.subr.mxu0 %v2439_v1 }
 0xac2   :  { %2331 = vmatpush3.msra.mxu0 %v3072_v52 }
 0xac3   :  { %2332 = vmatprep.subr.mxu0 %v2439_v1 }
 0xac4   :  { %2333 = vmatpush3.msra.mxu0 %v3079_v53 }
 0xac5   :  { %2334 = vmatprep.subr.mxu0 %v2439_v1 }
 0xac6   :  { %2335 = vmatpush3.msra.mxu0 %v3086_v54 }
 0xac7   :  { %2336 = vmatprep.subr.mxu0 %v2439_v1 }
 0xac8   :  { %2337 = vmatpush3.msra.mxu0 %v3093_v56 }
 0xac9   :  { %2338 = vmatprep.subr.mxu0 %v2439_v1 }
 0xaca   :  { %2339 = vmatpush3.msra.mxu0 %v3100_v63 }
 0xacb   :  { %2340 = vmatprep.subr.mxu0 %v2439_v1 }
 0xacc   :  { %2341 = vmatpush3.msra.mxu0 %v3143_v23 }
 0xacd   :  { %2342 = vmatprep.subr.mxu0 %v2439_v1 }
 0xace   :  { %2343 = vmatpush3.msra.mxu0 %v3150_v25 }
 0xacf   :  { %2344 = vmatprep.subr.mxu0 %v2439_v1 }
 0xad0   :  { %2345 = vmatpush3.msra.mxu0 %v3157_v26 }
 0xad1   :  { %2346 = vmatprep.subr.mxu0 %v2439_v1 }
 0xad2   :  { %2347 = vmatpush3.msra.mxu0 %v3164_v28 }
 0xad3   :  { %2348 = vmatprep.subr.mxu0 %v2439_v1 }
 0xad4   :  { %2349 = vmatpush3.msra.mxu0 %v3171_v30 }
 0xad5   :  { %2350 = vmatprep.subr.mxu0 %v2439_v1 }
 0xad6   :  { %2351 = vmatpush3.msra.mxu0 %v3178_v55 }
 0xad7   :  { %2352 = vmatprep.subr.mxu0 %v2439_v1 }
 0xad8   :  { %2353 = vmatpush3.msra.mxu0 %v3185_v3 }
 0xad9   :  { %2354 = vmatprep.subr.mxu0 %v2439_v1 }
 0xada   :  { %2355 = vmatpush3.msra.mxu0 %v3192_v4 }
 0xadb   :  { %2356 = vmatprep.subr.mxu0 %v2439_v1 }
 0xadc   :  { %2357 = vmatpush3.msra.mxu0 %v3199_v6 }
 0xadd   :  { %2358 = vmatprep.subr.mxu0 %v2439_v1 }
 0xade   :  { %2359 = vmatpush3.msra.mxu0 %v3206_v8 }
 0xb7f   :  { %v1280_v34 = vpop.f32.mrf.mxu0 }
 0xb80   :  { %v1284_v35 = vadd.f32 %v1280_v34, %v235_v60 }
 0xb81   :  { %v2292_v36 = vpop.f32.mrf.mxu0 }
 0xb82   :  { %2394 = vtanh.f32 %v1284_v35 }
 0xb8f   :  { %v2395_v37 = vpop.eup %2394 }
 0xb90   :  { %1286 = vst [vmem:[#allocation3 + $0x68] sm:$0xff] %v2395_v37  ;;  %2326 = vmatmul.mubr.f32.vlgmr.msra.gmra.mxu1 %v2395_v37 }
 0xc50   :  { %v1353_v39 = vpop.f32.mrf.mxu1 }
 0xc51   :  { %v1357_v40 = vadd.f32 %v1353_v39, %v240_v38 }
 0xc52   :  { %v2327_v1 = vpop.f32.mrf.mxu1 }
 0xc53   :  { %2396 = vtanh.f32 %v1357_v40 }
 0xc60   :  { %v2397_v41 = vpop.eup %2396 }
 0xc61   :  { %1359 = vst [vmem:[#allocation3 + $0x70] sm:$0xff] %v2397_v41  ;;  %2361 = vmatmul.mubr.f32.vlgmr.msra.gmra.mxu0 %v2397_v41 }
 0xd21   :  { %v1426_v44 = vpop.f32.mrf.mxu0 }
 0xd22   :  { %v1430_v59 = vadd.f32 %v1426_v44, %v245_v43 }
 0xd23   :  { %v2362_v45 = vpop.f32.mrf.mxu0 }
 0xd24   :  { %2398 = vtanh.f32 %v1430_v59 }
 0xd31   :  { %v2399_v46 = vpop.eup %2398 }
 0xd32   :  { %1432 = vst [vmem:[#allocation3 + $0x78] sm:$0xff] %v2399_v46 }
 0xd33   :  { %2428 = shalt.err (!%p2425_p4)
}
 0xd34   :  { %s2442_s23 = smov 128   ;;  %s2443_s24 = smov 8  }
 0xd35   :  { %1445 = dma.vmem_to_hbm [thread:$0]  %s1440_s21, 2048, %s3329_s4, [#allocation4], %s2442_s23, %s2442_s23, %s2443_s24  }
 0xd36   :  { %2437 = dma.done.wait [#allocation4], 2048  }
 0xd37   :  { %2438 = vsyncadd [#allocation4], 4294965248 }
 0xd38   :  { %1449 = vsyncpa [#allocation4], 1 }

</bundles_post_ra>
